<compile_context>
chip_gen: v7x
topology: tpu7x:2x2x1
jax: 0.10.0
libtpu: 0.0.40
codegen_flags: <defaults>
</compile_context>

<pallas_src>
import jax
import jax.numpy as jnp
from jax.experimental import pallas as pl
from jax.experimental.pallas import tpu as pltpu

# ---------------- rp constants (inferred) ----------------
IAB_NUM = 10
MAX_UE_PER_BS = 10
TRAIN_FEATURE = 4
BACKHAUL_NUM = 1
EPS = 1e-6  # TODO(synk): rp.eps value not given; assumed 1e-6

UNIT_INPUT = 4
EMB_SIZE = 20

IAB_FEATS = IAB_NUM * TRAIN_FEATURE                  # 40
UE_FEATS_PER_NODE = TRAIN_FEATURE * MAX_UE_PER_BS    # 40
X_FEATS = IAB_FEATS + UE_FEATS_PER_NODE * IAB_NUM    # 440

BIG_IN = EMB_SIZE * IAB_NUM                          # 200
BIG_HID = 20 * IAB_NUM                               # 200
BIG_OUT = 10
SMALL_IN = 20 * MAX_UE_PER_BS + 1                    # 201
SMALL_HID = SMALL_IN                                 # 201
SMALL_OUT = (MAX_UE_PER_BS + BACKHAUL_NUM) * 2       # 22
UEIDX_COLS = SMALL_OUT - 2                           # 20

_WEIGHT_NAMES = ("wb1", "bb1", "wb2", "bb2", "wb3", "bb3",
                 "ws1", "ws1l", "bs1", "ws2", "bs2", "ws3", "bs3")


# ---------------- in-kernel helpers ----------------
def _softmax_rows(z):
    m = jnp.max(z, axis=1, keepdims=True)
    e = jnp.exp(z - m)
    # reciprocal on the EUP slot instead of a full-width divide on the VALU
    return e * pl.reciprocal(jnp.sum(e, axis=1, keepdims=True), approx=True)


# ---------------- fused Pallas kernel ----------------
def fused_kernel(xi_ref, xu_ref, ind_ref,
                 wb1_ref, bb1_ref, wb2_ref, bb2_ref, wb3_ref, bb3_ref,
                 ws1_ref, ws1l_ref, bs1_ref, ws2_ref, bs2_ref, ws3_ref, bs3_ref,
                 out_ref):
    f32 = jnp.float32
    bf16 = jnp.bfloat16

    # ---- big model (embed folded into wb1/bb1): 40 -> 200 -> 200 -> 10, softmax ----
    xi = xi_ref[...].astype(bf16)                                            # (Bblk, 40)
    h = jnp.maximum(jnp.dot(xi, wb1_ref[...],
                            preferred_element_type=f32) + bb1_ref[...], 0.0)
    h = jnp.maximum(jnp.dot(h.astype(bf16), wb2_ref[...],
                            preferred_element_type=f32) + bb2_ref[...], 0.0)
    x_iabs = _softmax_rows(jnp.dot(h.astype(bf16), wb3_ref[...],
                                   preferred_element_type=f32) + bb3_ref[...])  # (Bblk, 10) f32

    # node-major stacked big-model column: rows [i*Bblk, (i+1)*Bblk) hold x_iabs[:, i]
    iab_col = jnp.concatenate([x_iabs[:, i:i + 1] for i in range(IAB_NUM)],
                              axis=0)                                        # (10*Bblk, 1) f32

    # ---- small model (embed folded into ws1/bs1): ALL 10 nodes as one M = 10*Bblk stream ----
    xu = xu_ref[...].astype(bf16)                                            # (10*Bblk, 40) node-major
    h1 = jnp.maximum(jnp.dot(xu, ws1_ref[...], preferred_element_type=f32)
                     + iab_col * ws1l_ref[...] + bs1_ref[...], 0.0)          # (10*Bblk, 201)
    h2 = jnp.maximum(jnp.dot(h1.astype(bf16), ws2_ref[...],
                             preferred_element_type=f32) + bs2_ref[...], 0.0)
    sm = _softmax_rows(jnp.dot(h2.astype(bf16), ws3_ref[...],
                               preferred_element_type=f32) + bs3_ref[...])   # (10*Bblk, 22)

    masked = sm * ind_ref[...].astype(f32)
    norm = jnp.sum(masked, axis=1, keepdims=True) + EPS                      # (10*Bblk, 1)
    # exact divide for the final normalization (narrow column -> negligible cost)
    out_ref[...] = masked * (iab_col / norm)                                 # (10*Bblk, 22)


# ---------------- wrapper ----------------
def _round_up(n, m):
    return ((n + m - 1) // m) * m


@jax.jit
def forward(kparams, x, UEIdx):
    B = x.shape[0]
    x = x.astype(jnp.float32)

    # batch tile: multiple of 8 (f32 sublanes); >=2 grid steps whenever B allows it so
    # dimension_semantics=("parallel",) can shard across v7x's two TensorCores; capped
    # at 256 so the 10x-stacked (M, 201) intermediates stay inside 32 MiB scoped VMEM.
    Bblk = min(256, max(8, _round_up((B + 1) // 2, 8)))
    Bp = _round_up(B, Bblk)
    grid = Bp // Bblk
    pad = Bp - B

    x_iab = x[:, :IAB_FEATS]                                                  # (B, 40)
    x_ue = x[:, IAB_FEATS:].reshape(B, IAB_NUM, UE_FEATS_PER_NODE)            # (B, 10, 40)
    # indicator in bf16 (exact for 0/1) to halve its HBM footprint
    ind = jnp.concatenate([UEIdx.astype(jnp.bfloat16),
                           jnp.ones((B, IAB_NUM, 2), jnp.bfloat16)], axis=2)  # (B, 10, 22)
    if pad:
        x_iab = jnp.pad(x_iab, ((0, pad), (0, 0)))
        x_ue = jnp.pad(x_ue, ((0, pad), (0, 0), (0, 0)))
        ind = jnp.pad(ind, ((0, pad), (0, 0), (0, 0)))

    # node-major, tile-major 2-D layout: row ((t*10 + i)*Bblk + b) <- [batch t*Bblk+b, node i]
    # -> every kernel ref is an aligned 2-D slab; no lane-misaligned slices inside the kernel.
    def stack_nodes(a):
        f = a.shape[-1]
        return (a.reshape(grid, Bblk, IAB_NUM, f)
                 .transpose(0, 2, 1, 3)
                 .reshape(grid * IAB_NUM * Bblk, f))

    x_ue2 = stack_nodes(x_ue)                                                 # (grid*10*Bblk, 40)
    ind2 = stack_nodes(ind)                                                   # (grid*10*Bblk, 22)

    weights = [kparams[n] for n in _WEIGHT_NAMES]
    in_specs = [pl.BlockSpec((Bblk, IAB_FEATS), lambda i: (i, 0)),
                pl.BlockSpec((IAB_NUM * Bblk, UE_FEATS_PER_NODE), lambda i: (i, 0)),
                pl.BlockSpec((IAB_NUM * Bblk, SMALL_OUT), lambda i: (i, 0))]
    # small weights: full-shape blocks, same block index every step -> resident in VMEM
    in_specs += [pl.BlockSpec(w.shape, lambda i: (0, 0)) for w in weights]

    out = pl.pallas_call(
        fused_kernel,
        grid=(grid,),
        in_specs=in_specs,
        out_specs=pl.BlockSpec((IAB_NUM * Bblk, SMALL_OUT), lambda i: (i, 0)),
        out_shape=jax.ShapeDtypeStruct((grid * IAB_NUM * Bblk, SMALL_OUT), jnp.float32),
        compiler_params=pltpu.CompilerParams(
            dimension_semantics=("parallel",),
            vmem_limit_bytes=32 * 1024 * 1024),
    )(x_iab, x_ue2, ind2, *weights)

    y = (out.reshape(grid, IAB_NUM, Bblk, SMALL_OUT)
            .transpose(0, 2, 1, 3)
            .reshape(Bp, IAB_NUM, SMALL_OUT))
    return y[:B]


# ---------------- parameters (deterministic, synthetic, torch-Linear-like init) ----------------
def init_params(key):
    ks = jax.random.split(key, 7)

    def lin(k, fin, fout):
        kw, kb = jax.random.split(k)
        s = 1.0 / jnp.sqrt(jnp.float32(fin))
        w = jax.random.uniform(kw, (fin, fout), jnp.float32, -s, s)
        b = jax.random.uniform(kb, (1, fout), jnp.float32, -s, s)
        return w, b

    embed_w, embed_b = lin(ks[0], UNIT_INPUT, EMB_SIZE)       # self.embed
    bw1, bb1 = lin(ks[1], BIG_IN, BIG_HID)                    # self.big
    bw2, bb2 = lin(ks[2], BIG_HID, BIG_HID)
    bw3, bb3 = lin(ks[3], BIG_HID, BIG_OUT)
    sw1, sb1 = lin(ks[4], SMALL_IN, SMALL_HID)                # self.small
    sw2, sb2 = lin(ks[5], SMALL_HID, SMALL_HID)
    sw3, sb3 = lin(ks[6], SMALL_HID, SMALL_OUT)
    # TODO(synk): self.smallDonor is never selected by the reference forward (IABInd==1 always);
    # its parameters are intentionally not materialized.
    return dict(embed_w=embed_w, embed_b=embed_b,
                bw1=bw1, bb1=bb1, bw2=bw2, bb2=bb2, bw3=bw3, bb3=bb3,
                sw1=sw1, sb1=sb1, sw2=sw2, sb2=sb2, sw3=sw3, sb3=sb3)


def pack_params(raw):
    """Fold the shared embed into layer 1 of both MLPs and pre-cast matmul weights to bf16."""
    ew, eb = raw["embed_w"], raw["embed_b"]
    # block-diagonal embed: 10 units of (4 -> 20) => (40, 200)
    wemb = jnp.zeros((IAB_NUM * UNIT_INPUT, IAB_NUM * EMB_SIZE), jnp.float32)
    for i in range(IAB_NUM):
        wemb = wemb.at[i * UNIT_INPUT:(i + 1) * UNIT_INPUT,
                       i * EMB_SIZE:(i + 1) * EMB_SIZE].set(ew)
    bemb = jnp.tile(eb, (1, IAB_NUM))                                     # (1, 200)

    wb1 = wemb @ raw["bw1"]                                               # (40, 200)
    bb1 = bemb @ raw["bw1"] + raw["bb1"]                                  # (1, 200)
    sw1m = raw["sw1"][:MAX_UE_PER_BS * EMB_SIZE, :]                       # (200, 201)
    sw1l = raw["sw1"][MAX_UE_PER_BS * EMB_SIZE:, :]                       # (1, 201)  iab column
    ws1 = wemb @ sw1m                                                     # (40, 201)
    bs1 = bemb @ sw1m + raw["sb1"]                                        # (1, 201)

    bf = lambda a: a.astype(jnp.bfloat16)
    return dict(
        wb1=bf(wb1), bb1=bb1,
        wb2=bf(raw["bw2"]), bb2=raw["bb2"],
        wb3=bf(raw["bw3"]), bb3=raw["bb3"],
        ws1=bf(ws1), ws1l=sw1l, bs1=bs1,
        ws2=bf(raw["sw2"]), bs2=raw["sb2"],
        ws3=bf(raw["sw3"]), bs3=raw["sb3"],
    )


# ---------------- pure-JAX reference (mirrors the PyTorch forward) ----------------
def reference_forward(raw, x, UEIdx):
    B = x.shape[0]
    x = x.astype(jnp.float32)
    ew, eb = raw["embed_w"], raw["embed_b"]

    big_in = (x[:, :IAB_FEATS].reshape(B * IAB_NUM, UNIT_INPUT) @ ew + eb
              ).reshape(B, IAB_NUM * EMB_SIZE)
    h = jax.nn.relu(big_in @ raw["bw1"] + raw["bb1"])
    h = jax.nn.relu(h @ raw["bw2"] + raw["bb2"])
    x_iabs = jax.nn.softmax(h @ raw["bw3"] + raw["bb3"], axis=1)

    ys = []
    for i in range(IAB_NUM):
        ue = x[:, IAB_FEATS + i * UE_FEATS_PER_NODE:IAB_FEATS + (i + 1) * UE_FEATS_PER_NODE]
        e = (ue.reshape(B * MAX_UE_PER_BS, UNIT_INPUT) @ ew + eb
             ).reshape(B, MAX_UE_PER_BS * EMB_SIZE)
        inp = jnp.concatenate([e, x_iabs[:, i:i + 1]], axis=1)
        h1 = jax.nn.relu(inp @ raw["sw1"] + raw["sb1"])
        h2 = jax.nn.relu(h1 @ raw["sw2"] + raw["sb2"])
        sm = jax.nn.softmax(h2 @ raw["sw3"] + raw["sb3"], axis=1)
        ind = jnp.concatenate([UEIdx[:, i, :].astype(jnp.float32),
                               jnp.ones((B, 2), jnp.float32)], axis=1)
        norm = jnp.sum(sm * ind, axis=1, keepdims=True) + EPS
        ys.append(sm * ind / norm * x_iabs[:, i:i + 1])
    return jnp.stack(ys, axis=1)


if __name__ == "__main__":
    key = jax.random.PRNGKey(0)
    kx, ku, kp = jax.random.split(key, 3)
    raw = init_params(kp)
    kparams = pack_params(raw)

    for B in (4, 19):   # B=19 exercises batch padding and a 2-step ("parallel") grid
        kxb, kub = jax.random.fold_in(kx, B), jax.random.fold_in(ku, B)
        x = jax.random.normal(kxb, (B, X_FEATS), jnp.float32)                  # (B, 440)
        UEIdx = (jax.random.uniform(kub, (B, IAB_NUM, UEIDX_COLS)) > 0.5
                 ).astype(jnp.float32)                                         # (B, 10, 20)

        y = forward(kparams, x, UEIdx)
        jax.block_until_ready(y)
        assert y.shape == (B, IAB_NUM, SMALL_OUT) and y.dtype == jnp.float32

        y_ref = reference_forward(raw, x, UEIdx)
        max_err = float(jnp.max(jnp.abs(y - y_ref)))
        assert max_err < 1e-2, f"mismatch vs reference (B={B}): {max_err}"

    print("KERNEL_OK")
</pallas_src>

<mosaic_0001>
module attributes {stable_mosaic.version = 11 : i64} {
  func.func @fused_kernel(%arg0: i32, %arg1: memref<8x40xf32, #tpu.memory_space<vmem>>, %arg2: memref<80x40xf32, #tpu.memory_space<vmem>>, %arg3: memref<80x22xbf16, #tpu.memory_space<vmem>>, %arg4: memref<40x200xbf16, #tpu.memory_space<vmem>>, %arg5: memref<1x200xf32, #tpu.memory_space<vmem>>, %arg6: memref<200x200xbf16, #tpu.memory_space<vmem>>, %arg7: memref<1x200xf32, #tpu.memory_space<vmem>>, %arg8: memref<200x10xbf16, #tpu.memory_space<vmem>>, %arg9: memref<1x10xf32, #tpu.memory_space<vmem>>, %arg10: memref<40x201xbf16, #tpu.memory_space<vmem>>, %arg11: memref<1x201xf32, #tpu.memory_space<vmem>>, %arg12: memref<1x201xf32, #tpu.memory_space<vmem>>, %arg13: memref<201x201xbf16, #tpu.memory_space<vmem>>, %arg14: memref<1x201xf32, #tpu.memory_space<vmem>>, %arg15: memref<201x22xbf16, #tpu.memory_space<vmem>>, %arg16: memref<1x22xf32, #tpu.memory_space<vmem>>, %arg17: memref<80x22xf32, #tpu.memory_space<vmem>>) attributes {dimension_semantics = [#tpu.dimension_semantics<parallel>], iteration_bounds = array<i64: 1>, scalar_prefetch = 0 : i64, scratch_operands = 0 : i64, tpu.core_type = #tpu.core_type<tc>, window_params = [{transform_indices = @transform_0, window_bounds = array<i64: 8, 40>}, {transform_indices = @transform_1, window_bounds = array<i64: 80, 40>}, {transform_indices = @transform_2, window_bounds = array<i64: 80, 22>}, {pipeline_mode = #tpu.pipeline_mode<synchronous>, transform_indices = @transform_3, window_bounds = array<i64: 40, 200>}, {pipeline_mode = #tpu.pipeline_mode<synchronous>, transform_indices = @transform_4, window_bounds = array<i64: 1, 200>}, {pipeline_mode = #tpu.pipeline_mode<synchronous>, transform_indices = @transform_5, window_bounds = array<i64: 200, 200>}, {pipeline_mode = #tpu.pipeline_mode<synchronous>, transform_indices = @transform_6, window_bounds = array<i64: 1, 200>}, {pipeline_mode = #tpu.pipeline_mode<synchronous>, transform_indices = @transform_7, window_bounds = array<i64: 200, 10>}, {pipeline_mode = #tpu.pipeline_mode<synchronous>, transform_indices = @transform_8, window_bounds = array<i64: 1, 10>}, {pipeline_mode = #tpu.pipeline_mode<synchronous>, transform_indices = @transform_9, window_bounds = array<i64: 40, 201>}, {pipeline_mode = #tpu.pipeline_mode<synchronous>, transform_indices = @transform_10, window_bounds = array<i64: 1, 201>}, {pipeline_mode = #tpu.pipeline_mode<synchronous>, transform_indices = @transform_11, window_bounds = array<i64: 1, 201>}, {pipeline_mode = #tpu.pipeline_mode<synchronous>, transform_indices = @transform_12, window_bounds = array<i64: 201, 201>}, {pipeline_mode = #tpu.pipeline_mode<synchronous>, transform_indices = @transform_13, window_bounds = array<i64: 1, 201>}, {pipeline_mode = #tpu.pipeline_mode<synchronous>, transform_indices = @transform_14, window_bounds = array<i64: 201, 22>}, {pipeline_mode = #tpu.pipeline_mode<synchronous>, transform_indices = @transform_15, window_bounds = array<i64: 1, 22>}, {transform_indices = @transform_16, window_bounds = array<i64: 80, 22>}]} {
    %c0 = arith.constant 0 : index
    %c0_0 = arith.constant 0 : index
    %0 = vector.load %arg1[%c0, %c0_0] : memref<8x40xf32, #tpu.memory_space<vmem>>, vector<8x40xf32>
    %1 = arith.truncf %0 : vector<8x40xf32> to vector<8x40xbf16>
    %c0_1 = arith.constant 0 : index
    %c0_2 = arith.constant 0 : index
    %2 = vector.load %arg4[%c0_1, %c0_2] : memref<40x200xbf16, #tpu.memory_space<vmem>>, vector<40x200xbf16>
    %cst = arith.constant dense<0.000000e+00> : vector<8x200xf32>
    %3 = tpu.matmul %1, %2, %cst {dimension_numbers = #tpu.dot_dimension_numbers<[1], [0], [0], [1], [0, 0, 1, 1], [], []>} : vector<8x40xbf16>, vector<40x200xbf16>, vector<8x200xf32> -> vector<8x200xf32>
    %c0_3 = arith.constant 0 : index
    %c0_4 = arith.constant 0 : index
    %4 = vector.load %arg5[%c0_3, %c0_4] : memref<1x200xf32, #tpu.memory_space<vmem>>, vector<1x200xf32>
    %5 = vector.broadcast %4 : vector<1x200xf32> to vector<8x200xf32>
    %6 = arith.addf %3, %5 : vector<8x200xf32>
    %cst_5 = arith.constant 0.000000e+00 : f32
    %7 = vector.broadcast %cst_5 : f32 to vector<8x200xf32>
    %8 = arith.maximumf %6, %7 : vector<8x200xf32>
    %9 = arith.truncf %8 : vector<8x200xf32> to vector<8x200xbf16>
    %c0_6 = arith.constant 0 : index
    %c0_7 = arith.constant 0 : index
    %10 = vector.load %arg6[%c0_6, %c0_7] : memref<200x200xbf16, #tpu.memory_space<vmem>>, vector<200x200xbf16>
    %cst_8 = arith.constant dense<0.000000e+00> : vector<8x200xf32>
    %11 = tpu.matmul %9, %10, %cst_8 {dimension_numbers = #tpu.dot_dimension_numbers<[1], [0], [0], [1], [0, 0, 1, 1], [], []>} : vector<8x200xbf16>, vector<200x200xbf16>, vector<8x200xf32> -> vector<8x200xf32>
    %c0_9 = arith.constant 0 : index
    %c0_10 = arith.constant 0 : index
    %12 = vector.load %arg7[%c0_9, %c0_10] : memref<1x200xf32, #tpu.memory_space<vmem>>, vector<1x200xf32>
    %13 = vector.broadcast %12 : vector<1x200xf32> to vector<8x200xf32>
    %14 = arith.addf %11, %13 : vector<8x200xf32>
    %cst_11 = arith.constant 0.000000e+00 : f32
    %15 = vector.broadcast %cst_11 : f32 to vector<8x200xf32>
    %16 = arith.maximumf %14, %15 : vector<8x200xf32>
    %17 = arith.truncf %16 : vector<8x200xf32> to vector<8x200xbf16>
    %c0_12 = arith.constant 0 : index
    %c0_13 = arith.constant 0 : index
    %18 = vector.load %arg8[%c0_12, %c0_13] : memref<200x10xbf16, #tpu.memory_space<vmem>>, vector<200x10xbf16>
    %cst_14 = arith.constant dense<0.000000e+00> : vector<8x10xf32>
    %19 = tpu.matmul %17, %18, %cst_14 {dimension_numbers = #tpu.dot_dimension_numbers<[1], [0], [0], [1], [0, 0, 1, 1], [], []>} : vector<8x200xbf16>, vector<200x10xbf16>, vector<8x10xf32> -> vector<8x10xf32>
    %c0_15 = arith.constant 0 : index
    %c0_16 = arith.constant 0 : index
    %20 = vector.load %arg9[%c0_15, %c0_16] : memref<1x10xf32, #tpu.memory_space<vmem>>, vector<1x10xf32>
    %21 = vector.broadcast %20 : vector<1x10xf32> to vector<8x10xf32>
    %22 = arith.addf %19, %21 : vector<8x10xf32>
    %cst_17 = arith.constant dense<0xFF800000> : vector<8xf32>
    %23 = vector.multi_reduction <maximumf>, %22, %cst_17 [1] : vector<8x10xf32> to vector<8xf32>
    %24 = vector.shape_cast %23 : vector<8xf32> to vector<8x1xf32>
    %25 = vector.broadcast %24 : vector<8x1xf32> to vector<8x10xf32>
    %26 = arith.subf %22, %25 : vector<8x10xf32>
    %27 = math.exp %26 : vector<8x10xf32>
    %cst_18 = arith.constant dense<0.000000e+00> : vector<8xf32>
    %28 = vector.multi_reduction <add>, %27, %cst_18 [1] : vector<8x10xf32> to vector<8xf32>
    %29 = vector.shape_cast %28 : vector<8xf32> to vector<8x1xf32>
    %30 = tpu.reciprocal %29 {approx = true} : vector<8x1xf32> -> vector<8x1xf32>
    %31 = vector.broadcast %30 : vector<8x1xf32> to vector<8x10xf32>
    %32 = arith.mulf %27, %31 : vector<8x10xf32>
    %33 = vector.extract_strided_slice %32 {offsets = [0, 0], sizes = [8, 1], strides = [1, 1]} : vector<8x10xf32> to vector<8x1xf32>
    %34 = vector.extract_strided_slice %32 {offsets = [0, 1], sizes = [8, 1], strides = [1, 1]} : vector<8x10xf32> to vector<8x1xf32>
    %35 = vector.extract_strided_slice %32 {offsets = [0, 2], sizes = [8, 1], strides = [1, 1]} : vector<8x10xf32> to vector<8x1xf32>
    %36 = vector.extract_strided_slice %32 {offsets = [0, 3], sizes = [8, 1], strides = [1, 1]} : vector<8x10xf32> to vector<8x1xf32>
    %37 = vector.extract_strided_slice %32 {offsets = [0, 4], sizes = [8, 1], strides = [1, 1]} : vector<8x10xf32> to vector<8x1xf32>
    %38 = vector.extract_strided_slice %32 {offsets = [0, 5], sizes = [8, 1], strides = [1, 1]} : vector<8x10xf32> to vector<8x1xf32>
    %39 = vector.extract_strided_slice %32 {offsets = [0, 6], sizes = [8, 1], strides = [1, 1]} : vector<8x10xf32> to vector<8x1xf32>
    %40 = vector.extract_strided_slice %32 {offsets = [0, 7], sizes = [8, 1], strides = [1, 1]} : vector<8x10xf32> to vector<8x1xf32>
    %41 = vector.extract_strided_slice %32 {offsets = [0, 8], sizes = [8, 1], strides = [1, 1]} : vector<8x10xf32> to vector<8x1xf32>
    %42 = vector.extract_strided_slice %32 {offsets = [0, 9], sizes = [8, 1], strides = [1, 1]} : vector<8x10xf32> to vector<8x1xf32>
    %43 = tpu.concatenate %33, %34, %35, %36, %37, %38, %39, %40, %41, %42 in 0 : vector<8x1xf32>, vector<8x1xf32>, vector<8x1xf32>, vector<8x1xf32>, vector<8x1xf32>, vector<8x1xf32>, vector<8x1xf32>, vector<8x1xf32>, vector<8x1xf32>, vector<8x1xf32> -> vector<80x1xf32>
    %c0_19 = arith.constant 0 : index
    %c0_20 = arith.constant 0 : index
    %44 = vector.load %arg2[%c0_19, %c0_20] : memref<80x40xf32, #tpu.memory_space<vmem>>, vector<80x40xf32>
    %45 = arith.truncf %44 : vector<80x40xf32> to vector<80x40xbf16>
    %c0_21 = arith.constant 0 : index
    %c0_22 = arith.constant 0 : index
    %46 = vector.load %arg10[%c0_21, %c0_22] : memref<40x201xbf16, #tpu.memory_space<vmem>>, vector<40x201xbf16>
    %cst_23 = arith.constant dense<0.000000e+00> : vector<80x201xf32>
    %47 = tpu.matmul %45, %46, %cst_23 {dimension_numbers = #tpu.dot_dimension_numbers<[1], [0], [0], [1], [0, 0, 1, 1], [], []>} : vector<80x40xbf16>, vector<40x201xbf16>, vector<80x201xf32> -> vector<80x201xf32>
    %c0_24 = arith.constant 0 : index
    %c0_25 = arith.constant 0 : index
    %48 = vector.load %arg11[%c0_24, %c0_25] : memref<1x201xf32, #tpu.memory_space<vmem>>, vector<1x201xf32>
    %49 = vector.broadcast %43 : vector<80x1xf32> to vector<80x201xf32>
    %50 = vector.broadcast %48 : vector<1x201xf32> to vector<80x201xf32>
    %51 = arith.mulf %49, %50 : vector<80x201xf32>
    %52 = arith.addf %47, %51 : vector<80x201xf32>
    %c0_26 = arith.constant 0 : index
    %c0_27 = arith.constant 0 : index
    %53 = vector.load %arg12[%c0_26, %c0_27] : memref<1x201xf32, #tpu.memory_space<vmem>>, vector<1x201xf32>
    %54 = vector.broadcast %53 : vector<1x201xf32> to vector<80x201xf32>
    %55 = arith.addf %52, %54 : vector<80x201xf32>
    %cst_28 = arith.constant 0.000000e+00 : f32
    %56 = vector.broadcast %cst_28 : f32 to vector<80x201xf32>
    %57 = arith.maximumf %55, %56 : vector<80x201xf32>
    %58 = arith.truncf %57 : vector<80x201xf32> to vector<80x201xbf16>
    %c0_29 = arith.constant 0 : index
    %c0_30 = arith.constant 0 : index
    %59 = vector.load %arg13[%c0_29, %c0_30] : memref<201x201xbf16, #tpu.memory_space<vmem>>, vector<201x201xbf16>
    %cst_31 = arith.constant dense<0.000000e+00> : vector<80x201xf32>
    %60 = tpu.matmul %58, %59, %cst_31 {dimension_numbers = #tpu.dot_dimension_numbers<[1], [0], [0], [1], [0, 0, 1, 1], [], []>} : vector<80x201xbf16>, vector<201x201xbf16>, vector<80x201xf32> -> vector<80x201xf32>
    %c0_32 = arith.constant 0 : index
    %c0_33 = arith.constant 0 : index
    %61 = vector.load %arg14[%c0_32, %c0_33] : memref<1x201xf32, #tpu.memory_space<vmem>>, vector<1x201xf32>
    %62 = vector.broadcast %61 : vector<1x201xf32> to vector<80x201xf32>
    %63 = arith.addf %60, %62 : vector<80x201xf32>
    %cst_34 = arith.constant 0.000000e+00 : f32
    %64 = vector.broadcast %cst_34 : f32 to vector<80x201xf32>
    %65 = arith.maximumf %63, %64 : vector<80x201xf32>
    %66 = arith.truncf %65 : vector<80x201xf32> to vector<80x201xbf16>
    %c0_35 = arith.constant 0 : index
    %c0_36 = arith.constant 0 : index
    %67 = vector.load %arg15[%c0_35, %c0_36] : memref<201x22xbf16, #tpu.memory_space<vmem>>, vector<201x22xbf16>
    %cst_37 = arith.constant dense<0.000000e+00> : vector<80x22xf32>
    %68 = tpu.matmul %66, %67, %cst_37 {dimension_numbers = #tpu.dot_dimension_numbers<[1], [0], [0], [1], [0, 0, 1, 1], [], []>} : vector<80x201xbf16>, vector<201x22xbf16>, vector<80x22xf32> -> vector<80x22xf32>
    %c0_38 = arith.constant 0 : index
    %c0_39 = arith.constant 0 : index
    %69 = vector.load %arg16[%c0_38, %c0_39] : memref<1x22xf32, #tpu.memory_space<vmem>>, vector<1x22xf32>
    %70 = vector.broadcast %69 : vector<1x22xf32> to vector<80x22xf32>
    %71 = arith.addf %68, %70 : vector<80x22xf32>
    %cst_40 = arith.constant dense<0xFF800000> : vector<80xf32>
    %72 = vector.multi_reduction <maximumf>, %71, %cst_40 [1] : vector<80x22xf32> to vector<80xf32>
    %73 = vector.shape_cast %72 : vector<80xf32> to vector<80x1xf32>
    %74 = vector.broadcast %73 : vector<80x1xf32> to vector<80x22xf32>
    %75 = arith.subf %71, %74 : vector<80x22xf32>
    %76 = math.exp %75 : vector<80x22xf32>
    %cst_41 = arith.constant dense<0.000000e+00> : vector<80xf32>
    %77 = vector.multi_reduction <add>, %76, %cst_41 [1] : vector<80x22xf32> to vector<80xf32>
    %78 = vector.shape_cast %77 : vector<80xf32> to vector<80x1xf32>
    %79 = tpu.reciprocal %78 {approx = true} : vector<80x1xf32> -> vector<80x1xf32>
    %80 = vector.broadcast %79 : vector<80x1xf32> to vector<80x22xf32>
    %81 = arith.mulf %76, %80 : vector<80x22xf32>
    %c0_42 = arith.constant 0 : index
    %c0_43 = arith.constant 0 : index
    %82 = vector.load %arg3[%c0_42, %c0_43] : memref<80x22xbf16, #tpu.memory_space<vmem>>, vector<80x22xbf16>
    %83 = arith.extf %82 : vector<80x22xbf16> to vector<80x22xf32>
    %84 = arith.mulf %81, %83 : vector<80x22xf32>
    %cst_44 = arith.constant dense<0.000000e+00> : vector<80xf32>
    %85 = vector.multi_reduction <add>, %84, %cst_44 [1] : vector<80x22xf32> to vector<80xf32>
    %86 = vector.shape_cast %85 : vector<80xf32> to vector<80x1xf32>
    %cst_45 = arith.constant 9.99999997E-7 : f32
    %87 = vector.broadcast %cst_45 : f32 to vector<80x1xf32>
    %88 = arith.addf %86, %87 : vector<80x1xf32>
    %89 = arith.divf %43, %88 : vector<80x1xf32>
    %90 = vector.broadcast %89 : vector<80x1xf32> to vector<80x22xf32>
    %91 = arith.mulf %84, %90 : vector<80x22xf32>
    %c0_46 = arith.constant 0 : index
    %c0_47 = arith.constant 0 : index
    %92 = vector.load %arg17[%c0_46, %c0_47] : memref<80x22xf32, #tpu.memory_space<vmem>>, vector<80x22xf32>
    tpu.vector_store %arg17[%c0_46, %c0_47], %91 {strides = array<i32>} : memref<80x22xf32, #tpu.memory_space<vmem>>, vector<80x22xf32>,
    return
  }
  func.func @transform_0(%arg0: i32) -> (i32, i32) {
    %c0_i32 = arith.constant 0 : i32
    %c0_i32_0 = arith.constant 0 : i32
    return %arg0, %c0_i32 : i32, i32
  }
  func.func @transform_1(%arg0: i32) -> (i32, i32) {
    %c0_i32 = arith.constant 0 : i32
    %c0_i32_0 = arith.constant 0 : i32
    return %arg0, %c0_i32 : i32, i32
  }
  func.func @transform_2(%arg0: i32) -> (i32, i32) {
    %c0_i32 = arith.constant 0 : i32
    %c0_i32_0 = arith.constant 0 : i32
    return %arg0, %c0_i32 : i32, i32
  }
  func.func @transform_3(%arg0: i32) -> (i32, i32) {
    %c0_i32 = arith.constant 0 : i32
    %c0_i32_0 = arith.constant 0 : i32
    %c0_i32_1 = arith.constant 0 : i32
    return %c0_i32, %c0_i32_0 : i32, i32
  }
  func.func @transform_4(%arg0: i32) -> (i32, i32) {
    %c0_i32 = arith.constant 0 : i32
    %c0_i32_0 = arith.constant 0 : i32
    %c0_i32_1 = arith.constant 0 : i32
    return %c0_i32, %c0_i32_0 : i32, i32
  }
  func.func @transform_5(%arg0: i32) -> (i32, i32) {
    %c0_i32 = arith.constant 0 : i32
    %c0_i32_0 = arith.constant 0 : i32
    %c0_i32_1 = arith.constant 0 : i32
    return %c0_i32, %c0_i32_0 : i32, i32
  }
  func.func @transform_6(%arg0: i32) -> (i32, i32) {
    %c0_i32 = arith.constant 0 : i32
    %c0_i32_0 = arith.constant 0 : i32
    %c0_i32_1 = arith.constant 0 : i32
    return %c0_i32, %c0_i32_0 : i32, i32
  }
  func.func @transform_7(%arg0: i32) -> (i32, i32) {
    %c0_i32 = arith.constant 0 : i32
    %c0_i32_0 = arith.constant 0 : i32
    %c0_i32_1 = arith.constant 0 : i32
    return %c0_i32, %c0_i32_0 : i32, i32
  }
  func.func @transform_8(%arg0: i32) -> (i32, i32) {
    %c0_i32 = arith.constant 0 : i32
    %c0_i32_0 = arith.constant 0 : i32
    %c0_i32_1 = arith.constant 0 : i32
    return %c0_i32, %c0_i32_0 : i32, i32
  }
  func.func @transform_9(%arg0: i32) -> (i32, i32) {
    %c0_i32 = arith.constant 0 : i32
    %c0_i32_0 = arith.constant 0 : i32
    %c0_i32_1 = arith.constant 0 : i32
    return %c0_i32, %c0_i32_0 : i32, i32
  }
  func.func @transform_10(%arg0: i32) -> (i32, i32) {
    %c0_i32 = arith.constant 0 : i32
    %c0_i32_0 = arith.constant 0 : i32
    %c0_i32_1 = arith.constant 0 : i32
    return %c0_i32, %c0_i32_0 : i32, i32
  }
  func.func @transform_11(%arg0: i32) -> (i32, i32) {
    %c0_i32 = arith.constant 0 : i32
    %c0_i32_0 = arith.constant 0 : i32
    %c0_i32_1 = arith.constant 0 : i32
    return %c0_i32, %c0_i32_0 : i32, i32
  }
  func.func @transform_12(%arg0: i32) -> (i32, i32) {
    %c0_i32 = arith.constant 0 : i32
    %c0_i32_0 = arith.constant 0 : i32
    %c0_i32_1 = arith.constant 0 : i32
    return %c0_i32, %c0_i32_0 : i32, i32
  }
  func.func @transform_13(%arg0: i32) -> (i32, i32) {
    %c0_i32 = arith.constant 0 : i32
    %c0_i32_0 = arith.constant 0 : i32
    %c0_i32_1 = arith.constant 0 : i32
    return %c0_i32, %c0_i32_0 : i32, i32
  }
  func.func @transform_14(%arg0: i32) -> (i32, i32) {
    %c0_i32 = arith.constant 0 : i32
    %c0_i32_0 = arith.constant 0 : i32
    %c0_i32_1 = arith.constant 0 : i32
    return %c0_i32, %c0_i32_0 : i32, i32
  }
  func.func @transform_15(%arg0: i32) -> (i32, i32) {
    %c0_i32 = arith.constant 0 : i32
    %c0_i32_0 = arith.constant 0 : i32
    %c0_i32_1 = arith.constant 0 : i32
    return %c0_i32, %c0_i32_0 : i32, i32
  }
  func.func @transform_16(%arg0: i32) -> (i32, i32) {
    %c0_i32 = arith.constant 0 : i32
    %c0_i32_0 = arith.constant 0 : i32
    return %arg0, %c0_i32 : i32, i32
  }
}

</mosaic_0001>

<bundles_post_ra>
// kernel: forward.1
= control target key start
LH: loop header
LB: loop body
LE: loop exit
PB: predicated region body
PF: predicated region fallthrough
CT: control target
= control target key end

     0   :  { %v1960_v1 = vmov 0   ;;  %vm102_vm0 = vcmask 1043456   ;;  %vm98_vm1 = vcmask 326656   ;;  %v63_v50 = vlaneseq  ;;  %s1961_s24 = smov 125   ;;  %s1962_s25 = smov 127   ;;  %s2798_s3 = inlined_call_operand.vmem [shape: bf16[40,200], index: 3, kind: input, shape index: {}]   ;;  %s2799_s5 = inlined_call_operand.vmem [shape: bf16[200,200], index: 5, kind: input, shape index: {}]   ;;  %s2800_s0 = inlined_call_operand.vmem [shape: f32[8,40], index: 0, kind: input, shape index: {}]   ;;  %s2801_s7 = inlined_call_operand.vmem [shape: bf16[200,10], index: 7, kind: input, shape index: {}]   ;;  %s2802_s4 = inlined_call_operand.vmem [shape: f32[1,200], index: 4, kind: input, shape index: {}]   ;;  %s2803_s6 = inlined_call_operand.vmem [shape: f32[1,200], index: 6, kind: input, shape index: {}]   ;;  %s2804_s8 = inlined_call_operand.vmem [shape: f32[1,10], index: 8, kind: input, shape index: {}]   ;;  %s2805_s9 = inlined_call_operand.vmem [shape: bf16[40,201], index: 9, kind: input, shape index: {}]   ;;  %s2806_s1 = inlined_call_operand.vmem [shape: f32[80,40], index: 1, kind: input, shape index: {}]   ;;  %s2807_s12 = inlined_call_operand.vmem [shape: bf16[201,201], index: 12, kind: input, shape index: {}]   ;;  %s2808_s14 = inlined_call_operand.vmem [shape: bf16[201,22], index: 14, kind: input, shape index: {}]   ;;  %s2809_s10 = inlined_call_operand.vmem [shape: f32[1,201], index: 10, kind: input, shape index: {}]   ;;  %s2810_s11 = inlined_call_operand.vmem [shape: f32[1,201], index: 11, kind: input, shape index: {}]   ;;  %s2811_s13 = inlined_call_operand.vmem [shape: f32[1,201], index: 13, kind: input, shape index: {}]   ;;  %s2812_s15 = inlined_call_operand.vmem [shape: f32[1,22], index: 15, kind: input, shape index: {}]   ;;  %s2813_s2 = inlined_call_operand.vmem [shape: bf16[80,22], index: 2, kind: input, shape index: {}]   ;;  %s2814_s16 = inlined_call_operand.vmem [shape: f32[80,22], index: 16, kind: output, shape index: {}]  }
   0x1   :  { %2816 = sst [smem:[#allocation2_spill]] %s2798_s3  ;;  %141 = vmatprep.mubr.bf16.mxu0 %v1960_v1  ;;  %1775 = vset.pattern.permute.xlu0 %v1960_v1  ;;  %v1785_v8 = vld [vmem:[%s2799_s5 + $0x4] ss:$8 sps:$4 sm:$0xff]   ;;  %v1787_v9 = vld [vmem:[%s2799_s5] ss:$8 sps:$4 sm:$0xff]   ;;  %v1825_v41 = vld [vmem:[%s2801_s7 + $0x10] sm:$0xff]  }
   0x2   :  { %s2817_s23 = sld [smem:[#allocation2_spill]]  ;;  %1776 = vset.pattern.permute.xlu1 %v1960_v1  ;;  %v1788_v10 = vld [vmem:[%s2799_s5 + $0x14] ss:$8 sps:$4 sm:$0xff]   ;;  %v54_v11 = vld [vmem:[%s2800_s0] sm:$0xff]  ;;  %326 = vmatprep.subr.bf16.mxu1 %v1785_v8  ;;  %v1790_v12 = vld [vmem:[%s2799_s5 + $0x10] ss:$8 sps:$4 sm:$0xff]  }
   0x3   :  { %327 = vmatpush1.bf16.msra.mxu1 %v1787_v9  ;;  %v1791_v14 = vld [vmem:[%s2799_s5 + $0x24] ss:$8 sps:$4 sm:$0xff]   ;;  %v55_v15 = vpack.c.bf16 %v54_v11, %v54_v11  ;;  %v1793_v16 = vld [vmem:[%s2799_s5 + $0x20] ss:$8 sps:$4 sm:$0xff]   ;;  %v1794_v17 = vld [vmem:[%s2799_s5 + $0x34] ss:$8 sps:$4 sm:$0xff]  }
   0x4   :  { %328 = vmatprep.subr.bf16.mxu1 %v1788_v10  ;;  %v1796_v18 = vld [vmem:[%s2799_s5 + $0x30] ss:$8 sps:$4 sm:$0xff]   ;;  %v1797_v19 = vld [vmem:[%s2799_s5 + $0x44] ss:$8 sps:$4 sm:$0xff]   ;;  %v1799_v20 = vld [vmem:[%s2799_s5 + $0x40] ss:$8 sps:$4 sm:$0xff]  }
   0x5   :  { %v1800_v21 = vld [vmem:[%s2799_s5 + $0x54] ss:$8 sps:$4 sm:$0xff]   ;;  %v1802_v22 = vld [vmem:[%s2799_s5 + $0x50] ss:$8 sps:$4 sm:$0xff]   ;;  %v1803_v23 = vld [vmem:[%s2799_s5 + $0x64] ss:$8 sps:$4 sm:$0xff]  }
   0x6   :  { %v1805_v24 = vld [vmem:[%s2799_s5 + $0x60] ss:$8 sps:$4 sm:$0xff]   ;;  %v1806_v25 = vld [vmem:[%s2799_s5 + $0x74] ss:$8 sps:$4 sm:$0xff]   ;;  %v1808_v26 = vld [vmem:[%s2799_s5 + $0x70] ss:$8 sps:$4 sm:$0xff]  }
   0x7   :  { %329 = vmatpush1.bf16.msra.mxu1 %v1790_v12  ;;  %v1809_v27 = vld [vmem:[%s2799_s5 + $0x84] ss:$8 sps:$4 sm:$0xff]   ;;  %v1811_v28 = vld [vmem:[%s2799_s5 + $0x80] ss:$8 sps:$4 sm:$0xff]   ;;  %v1812_v29 = vld [vmem:[%s2799_s5 + $0x94] ss:$8 sps:$4 sm:$0xff]  }
   0x8   :  { %v1777_v0 = vld [vmem:[%s2817_s23 + $0x4] ss:$8 sps:$4 sm:$0xff]   ;;  %v1779_v2 = vld [vmem:[%s2817_s23] ss:$8 sps:$4 sm:$0xff]   ;;  %v1780_v3 = vld [vmem:[%s2817_s23 + $0x14] ss:$8 sps:$4 sm:$0xff]   ;;  %330 = vmatprep.subr.bf16.mxu1 %v1791_v14 }
   0x9   :  { %109 = vmatprep.subr.bf16.mxu0 %v1777_v0  ;;  %v60_v4 = vld [vmem:[%s2817_s23 + $0x20] sm:$0xff]  ;;  %v1782_v5 = vld [vmem:[%s2817_s23 + $0x10] ss:$8 sps:$4 sm:$0xff]   ;;  %v1818_v33 = vld [vmem:[%s2799_s5 + $0xb4] ss:$8 sps:$4 sm:$0xff]   ;;  %v64_v51 = vshrl.u32 %v63_v50, 7 }
   0xa   :  { %110 = vmatpush1.bf16.msra.mxu0 %v1779_v2  ;;  %v1632_v6 = vcombine.high %v60_v4, %v60_v4  ;;  %v1631_v7 = vcombine.low %v60_v4, %v60_v4  ;;  %v1814_v30 = vld [vmem:[%s2799_s5 + $0x90] ss:$8 sps:$4 sm:$0xff]   ;;  %v1815_v31 = vld [vmem:[%s2799_s5 + $0xa4] ss:$8 sps:$4 sm:$0xff]   ;;  %v1817_v32 = vld [vmem:[%s2799_s5 + $0xa0] ss:$8 sps:$4 sm:$0xff]  }
   0xb   :  { %111 = vmatprep.subr.bf16.mxu0 %v1780_v3  ;;  %331 = vmatpush1.bf16.msra.mxu1 %v1793_v16  ;;  %v1820_v34 = vld [vmem:[%s2799_s5 + $0xb0] ss:$8 sps:$4 sm:$0xff]   ;;  %v178_v35 = vld [vmem:[%s2799_s5 + $0xc0] sm:$0xff]  ;;  %v1824_v40 = vld [vmem:[%s2801_s7 + $0x8] sm:$0xff]   ;;  %v2202_v52 = vsub.s32 0, %v64_v51  ;;  %v2207_v54 = vsub.s32 1, %v64_v51 }
   0xc   :  { %v104_v13 = vsel %vm102_vm0, %v1631_v7, 0  ;;  %332 = vmatprep.subr.bf16.mxu1 %v1794_v17  ;;  %v1660_v36 = vcombine.high %v178_v35, %v178_v35  ;;  %v1659_v37 = vcombine.low %v178_v35, %v178_v35  ;;  %v1823_v39 = vld [vmem:[%s2801_s7] sm:$0xff]   ;;  %v1826_v42 = vld [vmem:[%s2801_s7 + $0x18] sm:$0xff]   ;;  %v1828_v44 = vld [vmem:[%s2801_s7 + $0x28] sm:$0xff]   ;;  %vm316_vm2 = vcmask 588800   ;;  %s1963_s5 = smov 126  }
   0xd   :  { %v1827_v43 = vld [vmem:[%s2801_s7 + $0x20] sm:$0xff]   ;;  %v1829_v45 = vld [vmem:[%s2801_s7 + $0x30] sm:$0xff]   ;;  %v1830_v46 = vld [vmem:[%s2801_s7 + $0x38] sm:$0xff]   ;;  %vm524_vm3 = vcmask 80896   ;;  %s1965_s23 = smov 123   ;;  %s1966_s26 = smov 122  }
   0xe   :  { %112 = vmatpush1.bf16.msra.mxu0 %v1782_v5  ;;  %v321_v38 = vsel %vm102_vm0, %v1659_v37, 0  ;;  %v1831_v47 = vld [vmem:[%s2801_s7 + $0x40] sm:$0xff]   ;;  %v1832_v48 = vld [vmem:[%s2801_s7 + $0x48] sm:$0xff]   ;;  %v1833_v49 = vld [vmem:[%s2801_s7 + $0x50] sm:$0xff]   ;;  %s1967_s30 = smov 121   ;;  %s1968_s18 = smov 120  }
   0xf   :  { %1633 = vmatprep.subr.msk.bf16.mxu0 %vm102_vm0, %v1632_v6  ;;  %333 = vmatpush1.bf16.msra.mxu1 %v1796_v18  ;;  %v61_v53 = vld [vmem:[%s2802_s4] sm:$0x3]  ;;  %v1834_v4 = vld [vmem:[%s2801_s7 + $0x58] sm:$0xff]   ;;  %v565_v35 = vld [vmem:[%s2806_s1 + $0x8] sm:$0xff]  ;;  %s1969_s22 = smov 119   ;;  %vm1029_vm4 = vcmask 1044480  }
  0x10   :  { %334 = vmatprep.subr.bf16.mxu1 %v1797_v19  ;;  %v66_v55 = vrot.slane %v61_v53, %v2202_v52  ;;  %v70_v56 = vrot.slane %v61_v53, %v2207_v54  ;;  %v1835_v5 = vld [vmem:[%s2801_s7 + $0x60] ss:$0 sps:$4 sm:$0xff]   ;;  %v571_v50 = vld [vmem:[%s2806_s1 + $0x38] sm:$0xff]  ;;  %vm1013_vm5 = vcmask 596992   ;;  %vm1352_vm6 = vcmask 179200  }
  0x11   :  { %v482_v6 = vsel %vm102_vm0, %v1835_v5, 0  ;;  %v179_v7 = vld [vmem:[%s2803_s6] sm:$0x3]  ;;  %v1852_v5 = vld [vmem:[%s2807_s12 + $0x24] ss:$8 sps:$4 sm:$0xff]  }
  0x12   :  { %114 = vmatpush1.bf16.msra.mxu0 %v104_v13  ;;  %v184_v8 = vrot.slane %v179_v7, %v2202_v52  ;;  %v188_v9 = vrot.slane %v179_v7, %v2207_v54  ;;  %v572_v53 = vld [vmem:[%s2806_s1 + $0x40] sm:$0xff]  ;;  %v1855_v7 = vld [vmem:[%s2807_s12 + $0x34] ss:$8 sps:$4 sm:$0xff]  }
  0x13   :  { %484 = vmatprep.subr.bf16.mxu0 %v1960_v1  ;;  %335 = vmatpush1.bf16.msra.mxu1 %v1799_v20  ;;  %v1663_v20 = vld [vmem:[%s2804_s8] ss:$0 sm:$0xff] }
  0x14   :  { %336 = vmatprep.subr.bf16.mxu1 %v1800_v21 }
  0x15   :  { %1634 = vmatmul.mubr.msk.bf16.vlgmr.msra.gmra.mrb[0].mxu0 %vm98_vm1, %v55_v15 }
  0x16   :  { %485 = vmatpush1.bf16.msra.mxu0 %v1823_v39 }
  0x17   :  { %337 = vmatpush1.bf16.msra.mxu1 %v1802_v22  ;;  %486 = vmatprep.subr.bf16.mxu0 %v1960_v1 }
  0x18   :  { %338 = vmatprep.subr.bf16.mxu1 %v1803_v23 }
  0x1a   :  { %487 = vmatpush1.bf16.msra.mxu0 %v1824_v40 }
  0x1b   :  { %339 = vmatpush1.bf16.msra.mxu1 %v1805_v24  ;;  %488 = vmatprep.subr.bf16.mxu0 %v1960_v1 }
  0x1c   :  { %340 = vmatprep.subr.bf16.mxu1 %v1806_v25 }
  0x1e   :  { %489 = vmatpush1.bf16.msra.mxu0 %v1825_v41 }
  0x1f   :  { %341 = vmatpush1.bf16.msra.mxu1 %v1808_v26  ;;  %490 = vmatprep.subr.bf16.mxu0 %v1960_v1 }
  0x20   :  { %342 = vmatprep.subr.bf16.mxu1 %v1809_v27  ;;  %v1836_v27 = vld [vmem:[%s2805_s9] ss:$8 sps:$4 sm:$0xff]  }
  0x22   :  { %491 = vmatpush1.bf16.msra.mxu0 %v1826_v42 }
  0x23   :  { %343 = vmatpush1.bf16.msra.mxu1 %v1811_v28  ;;  %492 = vmatprep.subr.bf16.mxu0 %v1960_v1  ;;  %v1838_v28 = vld [vmem:[%s2805_s9 + $0x4] ss:$8 sps:$4 sm:$0xff]  }
  0x24   :  { %344 = vmatprep.subr.bf16.mxu1 %v1812_v29  ;;  %v1841_v29 = vld [vmem:[%s2805_s9 + $0x14] ss:$8 sps:$4 sm:$0xff]  }
  0x26   :  { %493 = vmatpush1.bf16.msra.mxu0 %v1827_v43  ;;  %v566_v43 = vld [vmem:[%s2806_s1 + $0x10] sm:$0xff] }
  0x27   :  { %345 = vmatpush1.bf16.msra.mxu1 %v1814_v30  ;;  %494 = vmatprep.subr.bf16.mxu0 %v1960_v1  ;;  %v583_v30 = vld [vmem:[%s2805_s9 + $0x20] sm:$0xff] }
  0x28   :  { %346 = vmatprep.subr.bf16.mxu1 %v1815_v31  ;;  %v1839_v31 = vld [vmem:[%s2805_s9 + $0x10] ss:$8 sps:$4 sm:$0xff]  }
  0x2a   :  { %495 = vmatpush1.bf16.msra.mxu0 %v1828_v44  ;;  %v567_v44 = vld [vmem:[%s2806_s1 + $0x18] sm:$0xff] }
  0x2b   :  { %347 = vmatpush1.bf16.msra.mxu1 %v1817_v32  ;;  %496 = vmatprep.subr.bf16.mxu0 %v1960_v1  ;;  %v1683_v32 = vcombine.high %v583_v30, %v583_v30 }
  0x2c   :  { %348 = vmatprep.subr.bf16.mxu1 %v1818_v33  ;;  %v1682_v33 = vcombine.low %v583_v30, %v583_v30  ;;  %v1877_v30 = vld [vmem:[%s2807_s12 + $0xb0] ss:$8 sps:$4 sm:$0xff]  }
  0x2e   :  { %497 = vmatpush1.bf16.msra.mxu0 %v1829_v45  ;;  %v575_v45 = vpack.c.bf16 %v567_v44, %v566_v43 }
  0x2f   :  { %349 = vmatpush1.bf16.msra.mxu1 %v1820_v34  ;;  %498 = vmatprep.subr.bf16.mxu0 %v1960_v1  ;;  %v564_v34 = vld [vmem:[%s2806_s1] sm:$0xff] }
  0x30   :  { %1661 = vmatprep.subr.msk.bf16.mxu1 %vm102_vm0, %v1660_v36  ;;  %v697_v36 = vsel %vm102_vm0, %v1682_v33, 0  ;;  %v574_v37 = vpack.c.bf16 %v565_v35, %v564_v34  ;;  %v1970_v33 = vmov 65535   ;;  %v1880_v35 = vld [vmem:[%s2807_s12 + $0xc0] ss:$8 sps:$4 sm:$0x1f]  }
  0x31   :  { %v1030_v34 = vsel %vm102_vm0, 4294967295, %v1970_v33 }
  0x32   :  { %499 = vmatpush1.bf16.msra.mxu0 %v1830_v46  ;;  %v568_v46 = vld [vmem:[%s2806_s1 + $0x20] sm:$0xff] }
  0x33   :  { %351 = vmatpush1.bf16.msra.mxu1 %v321_v38  ;;  %500 = vmatprep.subr.bf16.mxu0 %v1960_v1 }
  0x34   :  { %702 = vmatprep.subr.bf16.mxu1 %v1838_v28  ;;  %v1879_v28 = vld [vmem:[%s2807_s12 + $0xb4] ss:$8 sps:$4 sm:$0xff]  }
  0x36   :  { %501 = vmatpush1.bf16.msra.mxu0 %v1831_v47  ;;  %v569_v47 = vld [vmem:[%s2806_s1 + $0x28] sm:$0xff] }
  0x37   :  { %502 = vmatprep.subr.bf16.mxu0 %v1960_v1 }
  0x3a   :  { %503 = vmatpush1.bf16.msra.mxu0 %v1832_v48  ;;  %v576_v48 = vpack.c.bf16 %v569_v47, %v568_v46 }
  0x3b   :  { %504 = vmatprep.subr.bf16.mxu0 %v1960_v1 }
  0x3e   :  { %505 = vmatpush1.bf16.msra.mxu0 %v1833_v49  ;;  %v570_v49 = vld [vmem:[%s2806_s1 + $0x30] sm:$0xff] }
  0x3f   :  { %506 = vmatprep.subr.bf16.mxu0 %v1960_v1  ;;  %v577_v51 = vpack.c.bf16 %v571_v50, %v570_v49 }
  0x42   :  { %507 = vmatpush1.bf16.msra.mxu0 %v1834_v4  ;;  %v1847_v4 = vld [vmem:[%s2807_s12 + $0x10] ss:$8 sps:$4 sm:$0xff]  }
  0x43   :  { %508 = vmatprep.subr.bf16.mxu0 %v1960_v1 }
  0x46   :  { %509 = vmatpush1.bf16.msra.mxu0 %v482_v6  ;;  %v1850_v6 = vld [vmem:[%s2807_s12 + $0x20] ss:$8 sps:$4 sm:$0xff]  }
  0xe8   :  { %v143_v57 = vpop.f32.mrb[0].mxu0 }
  0xe9   :  { %v144_v58 = vadd.f32 %v143_v57, %v66_v55  ;;  %v145_v59 = vpop.f32.mrb[1].mxu0  ;;  %v573_v55 = vld [vmem:[%s2806_s1 + $0x48] sm:$0xff]  ;;  %s1964_s1 = smov 124  }
  0xea   :  { %v146_v60 = vadd.f32 %v145_v59, %v70_v56  ;;  %v147_v61 = vpop.f32.mrb[2].mxu0  ;;  %v578_v56 = vpack.c.bf16 %v573_v55, %v572_v53 }
  0xeb   :  { %v150_v62 = vmax.f32 %v144_v58, 0.0  ;;  %v148_v63 = vpop.f32.mrb[3].mxu0 }
  0xec   :  { %v151_v0 = vmax.f32 %v146_v60, 0.0  ;;  %v1844_v63 = vld [vmem:[%s2807_s12] ss:$8 sps:$4 sm:$0xff]  }
  0xed   :  { %v152_v3 = vpack.c.bf16 %v150_v62, %v150_v62 }
  0xee   :  { %v153_v2 = vpack.c.bf16 %v151_v0, %v151_v0 }
  0xf0   :  { %1662 = vmatprep.mubr.msk.bf16.mxu1 %vm316_vm2, %v153_v2  ;;  %v1846_v2 = vld [vmem:[%s2807_s12 + $0x4] ss:$8 sps:$4 sm:$0xff]  }
  0xf1   :  { %359 = vmatmul.mubr.bf16.vlgmr.msra.gmra.mrb[0].mxu1 %v152_v3  ;;  %v1849_v3 = vld [vmem:[%s2807_s12 + $0x14] ss:$8 sps:$4 sm:$0xff]   ;;  %1038 = vmatprep.subr.bf16.mxu0 %v1846_v2  ;;  %v1884_v2 = vld [vmem:[%s2808_s14 + $0x8] sm:$0xff]  }
  0xf2   :  { %734 = vmatprep.mubr.bf16.mxu1 %v1960_v1  ;;  %703 = vmatpush1.bf16.msra.mxu1 %v1836_v27 }
  0xf3   :  { %704 = vmatprep.subr.bf16.mxu1 %v1841_v29 }
  0xf6   :  { %705 = vmatpush1.bf16.msra.mxu1 %v1839_v31 }
  0xf7   :  { %1684 = vmatprep.subr.msk.bf16.mxu1 %vm102_vm0, %v1683_v32  ;;  %v1882_v32 = vld [vmem:[%s2807_s12 + $0xc4] ss:$8 sps:$4 sm:$0x1f]  }
  0xfa   :  { %707 = vmatpush1.bf16.msra.mxu1 %v697_v36  ;;  %v2405_v36 = vsel %vm1029_vm4, %v1030_v34, 0 }
  0xfb   :  { %1279 = vmatprep.subr.bf16.mxu1 %v1960_v1 }
  0xfd   :  { %1685 = vmatmul.mubr.msk.bf16.vlgmr.msra.gmra.mrb[4].mxu1 %vm98_vm1, %v574_v37  ;;  %v1036_v37 = vand.u32 %v1882_v32, %v2405_v36 }
  0xfe   :  { %744 = vmatprep.mubr.bf16.mxu1 %v1960_v1 }
 0x105   :  { %1686 = vmatmul.mubr.msk.bf16.gmra.mrb[8].mxu1 %vm98_vm1, %v575_v45 }
 0x106   :  { %754 = vmatprep.mubr.bf16.mxu1 %v1960_v1 }
 0x10d   :  { %1687 = vmatmul.mubr.msk.bf16.gmra.mrb[12].mxu1 %vm98_vm1, %v576_v48 }
 0x10e   :  { %764 = vmatprep.mubr.bf16.mxu1 %v1960_v1 }
 0x115   :  { %1688 = vmatmul.mubr.msk.bf16.gmra.mrb[16].mxu1 %vm98_vm1, %v577_v51 }
 0x116   :  { %774 = vmatprep.mubr.bf16.mxu1 %v1960_v1 }
 0x11d   :  { %1689 = vmatmul.mubr.msk.bf16.gmra.mrb[20].mxu1 %vm98_vm1, %v578_v56 }
 0x1c4   :  { %v360_v10 = vpop.f32.mrb[0].mxu1 }
 0x1c5   :  { %v361_v11 = vadd.f32 %v360_v10, %v184_v8  ;;  %v362_v12 = vpop.f32.mrb[1].mxu1  ;;  %v1853_v8 = vld [vmem:[%s2807_s12 + $0x30] ss:$8 sps:$4 sm:$0xff]   ;;  %v1856_v10 = vld [vmem:[%s2807_s12 + $0x40] ss:$8 sps:$4 sm:$0xff]  }
 0x1c6   :  { %v363_v13 = vadd.f32 %v362_v12, %v188_v9  ;;  %v364_v14 = vpop.f32.mrb[2].mxu1  ;;  %v1858_v9 = vld [vmem:[%s2807_s12 + $0x44] ss:$8 sps:$4 sm:$0xff]   ;;  %v1859_v12 = vld [vmem:[%s2807_s12 + $0x50] ss:$8 sps:$4 sm:$0xff]  }
 0x1c7   :  { %v367_v15 = vmax.f32 %v361_v11, 0.0  ;;  %v365_v16 = vpop.f32.mrb[3].mxu1  ;;  %v1861_v11 = vld [vmem:[%s2807_s12 + $0x54] ss:$8 sps:$4 sm:$0xff]   ;;  %v1862_v14 = vld [vmem:[%s2807_s12 + $0x60] ss:$8 sps:$4 sm:$0xff]  }
 0x1c8   :  { %v368_v17 = vmax.f32 %v363_v13, 0.0  ;;  %v1864_v13 = vld [vmem:[%s2807_s12 + $0x64] ss:$8 sps:$4 sm:$0xff]   ;;  %v1865_v16 = vld [vmem:[%s2807_s12 + $0x70] ss:$8 sps:$4 sm:$0xff]  }
 0x1c9   :  { %v369_v19 = vpack.c.bf16 %v367_v15, %v367_v15  ;;  %v1867_v15 = vld [vmem:[%s2807_s12 + $0x74] ss:$8 sps:$4 sm:$0xff]  }
 0x1ca   :  { %v370_v18 = vpack.c.bf16 %v368_v17, %v368_v17  ;;  %v1870_v17 = vld [vmem:[%s2807_s12 + $0x84] ss:$8 sps:$4 sm:$0xff]  }
 0x1cc   :  { %1677 = vmatprep.mubr.msk.bf16.mxu0 %vm316_vm2, %v370_v18  ;;  %v1868_v18 = vld [vmem:[%s2807_s12 + $0x80] ss:$8 sps:$4 sm:$0xff]  }
 0x1cd   :  { %517 = vmatmul.mubr.bf16.vlgmr.msra.gmra.mrb[4].mxu0 %v369_v19  ;;  %v1873_v19 = vld [vmem:[%s2807_s12 + $0x94] ss:$8 sps:$4 sm:$0xff]  }
 0x1ce   :  { %1039 = vmatpush1.bf16.msra.mxu0 %v1844_v63  ;;  %v1883_v63 = vld [vmem:[%s2808_s14] sm:$0xff]  }
 0x1cf   :  { %1040 = vmatprep.subr.bf16.mxu0 %v1849_v3  ;;  %1280 = vmatpush1.bf16.msra.mxu1 %v1883_v63  ;;  %v1885_v3 = vld [vmem:[%s2808_s14 + $0x10] sm:$0xff]  }
 0x1d0   :  { %v2295_v60 = vpop.f32.mrb[4].mxu1  ;;  %1281 = vmatprep.subr.bf16.mxu1 %v1960_v1 }
 0x1d1   :  { %v2297_v61 = vpop.f32.mrb[5].mxu1 }
 0x1d2   :  { %v2301_v62 = vpop.f32.mrb[6].mxu1  ;;  %1041 = vmatpush1.bf16.msra.mxu0 %v1847_v4  ;;  %v1886_v4 = vld [vmem:[%s2808_s14 + $0x18] sm:$0xff]  }
 0x1d3   :  { %v2307_v0 = vpop.f32.mrb[7].mxu1  ;;  %1042 = vmatprep.subr.bf16.mxu0 %v1852_v5  ;;  %1282 = vmatpush1.bf16.msra.mxu1 %v1884_v2  ;;  %v1887_v5 = vld [vmem:[%s2808_s14 + $0x20] sm:$0xff]  }
 0x1d4   :  { %1283 = vmatprep.subr.bf16.mxu1 %v1960_v1 }
 0x1d6   :  { %1043 = vmatpush1.bf16.msra.mxu0 %v1850_v6  ;;  %v1888_v6 = vld [vmem:[%s2808_s14 + $0x28] sm:$0xff]  }
 0x1d7   :  { %1044 = vmatprep.subr.bf16.mxu0 %v1855_v7  ;;  %1284 = vmatpush1.bf16.msra.mxu1 %v1885_v3  ;;  %v1889_v7 = vld [vmem:[%s2808_s14 + $0x30] sm:$0xff]  }
 0x1d8   :  { %1285 = vmatprep.subr.bf16.mxu1 %v1960_v1 }
 0x1da   :  { %1045 = vmatpush1.bf16.msra.mxu0 %v1853_v8  ;;  %v1890_v8 = vld [vmem:[%s2808_s14 + $0x38] sm:$0xff]  }
 0x1db   :  { %1046 = vmatprep.subr.bf16.mxu0 %v1858_v9  ;;  %1286 = vmatpush1.bf16.msra.mxu1 %v1886_v4  ;;  %v1891_v9 = vld [vmem:[%s2808_s14 + $0x40] sm:$0xff]  }
 0x1dc   :  { %1287 = vmatprep.subr.bf16.mxu1 %v1960_v1 }
 0x1de   :  { %1047 = vmatpush1.bf16.msra.mxu0 %v1856_v10  ;;  %v1892_v10 = vld [vmem:[%s2808_s14 + $0x48] sm:$0xff]  }
 0x1df   :  { %1048 = vmatprep.subr.bf16.mxu0 %v1861_v11  ;;  %1288 = vmatpush1.bf16.msra.mxu1 %v1887_v5  ;;  %v584_v11 = vld [vmem:[%s2809_s10] sm:$0x3] }
 0x1e0   :  { %1289 = vmatprep.subr.bf16.mxu1 %v1960_v1 }
 0x1e2   :  { %1049 = vmatpush1.bf16.msra.mxu0 %v1859_v12  ;;  %v2495_v12 = vrot.slane %v584_v11, %v2202_v52 }
 0x1e3   :  { %1050 = vmatprep.subr.bf16.mxu0 %v1864_v13  ;;  %1290 = vmatpush1.bf16.msra.mxu1 %v1888_v6  ;;  %v2498_v13 = vrot.slane %v584_v11, %v2207_v54 }
 0x1e4   :  { %1291 = vmatprep.subr.bf16.mxu1 %v1960_v1 }
 0x1e6   :  { %1051 = vmatpush1.bf16.msra.mxu0 %v1862_v14 }
 0x1e7   :  { %1052 = vmatprep.subr.bf16.mxu0 %v1867_v15  ;;  %1292 = vmatpush1.bf16.msra.mxu1 %v1889_v7 }
 0x1e8   :  { %1293 = vmatprep.subr.bf16.mxu1 %v1960_v1 }
 0x1ea   :  { %1053 = vmatpush1.bf16.msra.mxu0 %v1865_v16  ;;  %v785_v16 = vld [vmem:[%s2810_s11] sm:$0x3] }
 0x1eb   :  { %1054 = vmatprep.subr.bf16.mxu0 %v1870_v17  ;;  %1294 = vmatpush1.bf16.msra.mxu1 %v1890_v8 }
 0x1ec   :  { %1295 = vmatprep.subr.bf16.mxu1 %v1960_v1 }
 0x1ee   :  { %1055 = vmatpush1.bf16.msra.mxu0 %v1868_v18  ;;  %v2506_v18 = vrot.slane %v785_v16, %v2202_v52 }
 0x1ef   :  { %1056 = vmatprep.subr.bf16.mxu0 %v1873_v19  ;;  %1296 = vmatpush1.bf16.msra.mxu1 %v1891_v9 }
 0x1f0   :  { %1297 = vmatprep.subr.bf16.mxu1 %v1960_v1 }
 0x1f3   :  { %1298 = vmatpush1.bf16.msra.mxu1 %v1892_v10 }
 0x1f4   :  { %1299 = vmatprep.subr.bf16.mxu1 %v1960_v1 }
 0x2a0   :  { %v518_v21 = vpop.f32.mrb[4].mxu0 }
 0x2a1   :  { %v519_v22 = vadd.f32 %v1663_v20, %v518_v21  ;;  %v520_v23 = vpop.f32.mrb[5].mxu0  ;;  %v1871_v20 = vld [vmem:[%s2807_s12 + $0x90] ss:$8 sps:$4 sm:$0xff]   ;;  %v1876_v21 = vld [vmem:[%s2807_s12 + $0xa4] ss:$8 sps:$4 sm:$0xff]  }
 0x2a2   :  { %v521_v24 = vpop.f32.mrb[6].mxu0  ;;  %1057 = vmatpush1.bf16.msra.mxu0 %v1871_v20  ;;  %v2375_v23 = vpop.f32.mrb[8].mxu1  ;;  %v2510_v20 = vrot.slane %v785_v16, %v2207_v54 }
 0x2a3   :  { %v522_v25 = vpop.f32.mrb[7].mxu0  ;;  %v525_v26 = vsel %vm524_vm3, %v519_v22, -inf  ;;  %1058 = vmatprep.subr.bf16.mxu0 %v1876_v21 }
 0x2a4   :  { %526 = vmax.xlane.f32.xlu0 %v525_v26  ;;  %v2383_v26 = vpop.f32.mrb[9].mxu1 }
 0x2a5   :  { %v2385_v27 = vpop.f32.mrb[10].mxu1 }
 0x2a6   :  { %v2390_v29 = vpop.f32.mrb[11].mxu1 }
 0x331   :  { %v527_v38 = vpop.xlane.xlu0 %526 }
 0x332   :  { %v528_v39 = vsub.f32 %v519_v22, %v527_v38  ;;  %v1874_v22 = vld [vmem:[%s2807_s12 + $0xa0] ss:$8 sps:$4 sm:$0xff]  }
 0x333   :  { %1059 = vmatpush1.bf16.msra.mxu0 %v1874_v22 }
 0x334   :  { %v529_v40 = vmul.f32 1.442695, %v528_v39  ;;  %1060 = vmatprep.subr.bf16.mxu0 %v1879_v28  ;;  %v1033_v39 = vand.u32 %v1880_v35, %v2405_v36 }
 0x336   :  { %1896 = vpow2.f32 %v529_v40  ;;  %v2412_v40 = vpop.f32.mrb[12].mxu1 }
 0x337   :  { %1061 = vmatpush1.bf16.msra.mxu0 %v1877_v30 }
 0x338   :  { %1062 = vmatprep.subr.bf16.mxu0 %v1036_v37 }
 0x33b   :  { %1063 = vmatpush1.bf16.msra.mxu0 %v1033_v39 }
 0x340   :  { %v1897_v41 = vpop.eup %1896 }
 0x341   :  { %v531_v42 = vsel %vm524_vm3, %v1897_v41, 0.0 }
 0x342   :  { %532 = vadd.xlane.f32.xlu0 %v531_v42 }
 0x3cf   :  { %v533_v57 = vpop.xlane.xlu0 %532 }
 0x3d0   :  { %1898 = vrcp.f32 %v533_v57 }
 0x3da   :  { %v1899_v58 = vpop.eup %1898 }
 0x3db   :  { %v2289_v59 = vmul.f32 %v1899_v58, %v1897_v41  ;;  %v2414_v41 = vpop.f32.mrb[13].mxu1 }
 0x3dc   :  { %v2419_v43 = vpop.f32.mrb[14].mxu1 }
 0x3dd   :  { %543 = vrot.lane.b32.xlu0 %v2289_v59, %s1961_s24  ;;  %537 = vrot.lane.b32.xlu1 %v2289_v59, %s1962_s25  ;;  %v2421_v44 = vpop.f32.mrb[15].mxu1 }
 0x3de   :  { %v2426_v46 = vpop.f32.mrb[16].mxu1 }
 0x3df   :  { %v2428_v47 = vpop.f32.mrb[17].mxu1 }
 0x3e0   :  { %v2433_v49 = vpop.f32.mrb[18].mxu1 }
 0x3e1   :  { %586 = vperm.xlu0 %1775, %v2289_v59   ;;  %540 = vrot.lane.b32.xlu1 %v2289_v59, %s1963_s5  ;;  %v2435_v50 = vpop.f32.mrb[19].mxu1 }
 0x3e2   :  { %v2440_v53 = vpop.f32.mrb[20].mxu1 }
 0x3e3   :  { %v2442_v55 = vpop.f32.mrb[21].mxu1 }
 0x3e4   :  { %v2447_v57 = vpop.f32.mrb[22].mxu1 }
 0x3e5   :  { %546 = vrot.lane.b32.xlu1 %v2289_v59, %s1964_s1  ;;  %v2449_v58 = vpop.f32.mrb[23].mxu1 }
 0x3e9   :  { %549 = vrot.lane.b32.xlu1 %v2289_v59, %s1965_s23 }
 0x3ed   :  { %552 = vrot.lane.b32.xlu1 %v2289_v59, %s1966_s26 }
 0x3f1   :  { %555 = vrot.lane.b32.xlu1 %v2289_v59, %s1967_s30 }
 0x3f5   :  { %558 = vrot.lane.b32.xlu1 %v2289_v59, %s1968_s18 }
 0x3f9   :  { %561 = vrot.lane.b32.xlu1 %v2289_v59, %s1969_s22 }
 0x44f   :  { %v2377_v24 = vpop.permute.xlu0 %543  ;;  %v2379_v25 = vpop.permute.xlu1 %537 }
 0x450   :  { %598 = vperm.xlu0 %1775, %v2377_v24   ;;  %590 = vperm.xlu1 %1776, %v2379_v25  }
 0x453   :  { %v2395_v31 = vpop.permute.xlu1 %540 }
 0x454   :  { %594 = vperm.xlu1 %1776, %v2395_v31  }
 0x457   :  { %v2408_v38 = vpop.permute.xlu1 %546 }
 0x458   :  { %602 = vperm.xlu1 %1776, %v2408_v38  }
 0x45b   :  { %v2416_v42 = vpop.permute.xlu1 %549 }
 0x45c   :  { %606 = vperm.xlu0 %1775, %v2416_v42  }
 0x45f   :  { %v2423_v45 = vpop.permute.xlu1 %552 }
 0x460   :  { %610 = vperm.xlu1 %1776, %v2423_v45   ;;  %v587_v14 = vpop.permute.xlu0 %586 }
 0x461   :  { %v636_v15 = vmul.f32 %v2495_v12, %v587_v14  ;;  %v637_v17 = vmul.f32 %v2498_v13, %v587_v14 }
 0x463   :  { %v2430_v48 = vpop.permute.xlu1 %555  ;;  %v737_v19 = vadd.f32 %v2295_v60, %v636_v15  ;;  %v739_v21 = vadd.f32 %v2297_v61, %v637_v17 }
 0x464   :  { %614 = vperm.xlu0 %1775, %v2430_v48  }
 0x465   :  { %v797_v35 = vadd.f32 %v2506_v18, %v737_v19  ;;  %v798_v37 = vadd.f32 %v2510_v20, %v739_v21 }
 0x467   :  { %v2437_v51 = vpop.permute.xlu1 %558  ;;  %v817_v5 = vmax.f32 %v797_v35, 0.0  ;;  %v818_v8 = vmax.f32 %v798_v37, 0.0 }
 0x468   :  { %618 = vperm.xlu1 %1776, %v2437_v51  }
 0x46b   :  { %v2444_v56 = vpop.permute.xlu1 %561 }
 0x46c   :  { %622 = vperm.xlu0 %1775, %v2444_v56  }
 0x4cf   :  { %v599_v22 = vpop.permute.xlu0 %598  ;;  %v591_v28 = vpop.permute.xlu1 %590 }
 0x4d0   :  { %v642_v30 = vmul.f32 %v2495_v12, %v599_v22  ;;  %v643_v32 = vmul.f32 %v2498_v13, %v599_v22  ;;  %v638_v33 = vmul.f32 %v2495_v12, %v591_v28  ;;  %v639_v34 = vmul.f32 %v2498_v13, %v591_v28 }
 0x4d2   :  { %v741_v60 = vadd.f32 %v2301_v62, %v638_v33  ;;  %v743_v39 = vadd.f32 %v2307_v0, %v639_v34  ;;  %v751_v61 = vadd.f32 %v2385_v27, %v642_v30  ;;  %v753_v63 = vadd.f32 %v2390_v29, %v643_v32 }
 0x4d3   :  { %v595_v2 = vpop.permute.xlu1 %594 }
 0x4d4   :  { %v799_v3 = vadd.f32 %v2506_v18, %v741_v60  ;;  %v800_v4 = vadd.f32 %v2510_v20, %v743_v39  ;;  %v640_v6 = vmul.f32 %v2495_v12, %v595_v2  ;;  %v641_v7 = vmul.f32 %v2498_v13, %v595_v2 }
 0x4d5   :  { %v803_v62 = vadd.f32 %v2506_v18, %v751_v61  ;;  %v804_v0 = vadd.f32 %v2510_v20, %v753_v63 }
 0x4d6   :  { %v819_v9 = vmax.f32 %v799_v3, 0.0  ;;  %v820_v10 = vmax.f32 %v800_v4, 0.0  ;;  %v747_v27 = vadd.f32 %v2375_v23, %v640_v6  ;;  %v749_v29 = vadd.f32 %v2383_v26, %v641_v7 }
 0x4d7   :  { %v603_v11 = vpop.permute.xlu1 %602  ;;  %v823_v22 = vmax.f32 %v803_v62, 0.0  ;;  %v824_v23 = vmax.f32 %v804_v0, 0.0 }
 0x4d8   :  { %v644_v14 = vmul.f32 %v2495_v12, %v603_v11  ;;  %v645_v15 = vmul.f32 %v2498_v13, %v603_v11  ;;  %v838_v16 = vpack.c.bf16 %v820_v10, %v818_v8  ;;  %v837_v17 = vpack.c.bf16 %v819_v9, %v817_v5 }
 0x4d9   :  { %v801_v19 = vadd.f32 %v2506_v18, %v747_v27  ;;  %v802_v21 = vadd.f32 %v2510_v20, %v749_v29 }
 0x4da   :  { %v759_v28 = vadd.f32 %v2414_v41, %v645_v15  ;;  %1716 = vmatprep.mubr.msk.bf16.mxu0 %vm1013_vm5, %v838_v16  ;;  %v757_v26 = vadd.f32 %v2412_v40, %v644_v14 }
 0x4db   :  { %v822_v30 = vmax.f32 %v802_v21, 0.0  ;;  %v607_v32 = vpop.permute.xlu0 %606  ;;  %1071 = vmatmul.mubr.bf16.vlgmr.msra.gmra.mrb[8].mxu0 %v837_v17  ;;  %v821_v33 = vmax.f32 %v801_v19, 0.0 }
 0x4dc   :  { %v646_v34 = vmul.f32 %v2495_v12, %v607_v32  ;;  %v647_v35 = vmul.f32 %v2498_v13, %v607_v32  ;;  %v806_v39 = vadd.f32 %v2510_v20, %v759_v28  ;;  %v805_v63 = vadd.f32 %v2506_v18, %v757_v26 }
 0x4dd   :  { %v840_v37 = vpack.c.bf16 %v824_v23, %v822_v30  ;;  %v839_v60 = vpack.c.bf16 %v823_v22, %v821_v33 }
 0x4de   :  { %v761_v61 = vadd.f32 %v2419_v43, %v646_v34  ;;  %v763_v41 = vadd.f32 %v2421_v44, %v647_v35  ;;  %v826_v6 = vmax.f32 %v806_v39, 0.0  ;;  %v825_v9 = vmax.f32 %v805_v63, 0.0 }
 0x4df   :  { %1717 = vmatprep.mubr.msk.bf16.mxu0 %vm1013_vm5, %v840_v37  ;;  %v611_v40 = vpop.permute.xlu1 %610 }
 0x4e0   :  { %v807_v2 = vadd.f32 %v2506_v18, %v761_v61  ;;  %v808_v3 = vadd.f32 %v2510_v20, %v763_v41  ;;  %v648_v4 = vmul.f32 %v2495_v12, %v611_v40  ;;  %v649_v5 = vmul.f32 %v2498_v13, %v611_v40 }
 0x4e2   :  { %v827_v7 = vmax.f32 %v807_v2, 0.0  ;;  %v828_v8 = vmax.f32 %v808_v3, 0.0  ;;  %v767_v43 = vadd.f32 %v2426_v46, %v648_v4  ;;  %v769_v44 = vadd.f32 %v2428_v47, %v649_v5  ;;  %v873_v3 = vld [vmem:[%s2811_s13] sm:$0x3] }
 0x4e3   :  { %v615_v10 = vpop.permute.xlu0 %614  ;;  %1081 = vmatmul.mubr.bf16.gmra.mrb[12].mxu0 %v839_v60  ;;  %v2590_v4 = vrot.slane %v873_v3, %v2202_v52  ;;  %v2593_v5 = vrot.slane %v873_v3, %v2207_v54 }
 0x4e4   :  { %v842_v62 = vpack.c.bf16 %v828_v8, %v826_v6  ;;  %v650_v0 = vmul.f32 %v2495_v12, %v615_v10  ;;  %v651_v27 = vmul.f32 %v2498_v13, %v615_v10  ;;  %v841_v29 = vpack.c.bf16 %v827_v7, %v825_v9 }
 0x4e5   :  { %v809_v14 = vadd.f32 %v2506_v18, %v767_v43  ;;  %v810_v15 = vadd.f32 %v2510_v20, %v769_v44 }
 0x4e6   :  { %v771_v11 = vadd.f32 %v2433_v49, %v650_v0  ;;  %1718 = vmatprep.mubr.msk.bf16.mxu0 %vm1013_vm5, %v842_v62  ;;  %v773_v46 = vadd.f32 %v2435_v50, %v651_v27 }
 0x4e7   :  { %v619_v16 = vpop.permute.xlu1 %618  ;;  %v829_v23 = vmax.f32 %v809_v14, 0.0  ;;  %v830_v30 = vmax.f32 %v810_v15, 0.0 }
 0x4e8   :  { %v811_v47 = vadd.f32 %v2506_v18, %v771_v11  ;;  %v652_v17 = vmul.f32 %v2495_v12, %v619_v16  ;;  %v653_v19 = vmul.f32 %v2498_v13, %v619_v16  ;;  %v812_v21 = vadd.f32 %v2510_v20, %v773_v46 }
 0x4ea   :  { %v831_v22 = vmax.f32 %v811_v47, 0.0  ;;  %v777_v49 = vadd.f32 %v2440_v53, %v652_v17  ;;  %v779_v28 = vadd.f32 %v2442_v55, %v653_v19  ;;  %v832_v26 = vmax.f32 %v812_v21, 0.0 }
 0x4eb   :  { %v623_v32 = vpop.permute.xlu0 %622  ;;  %1091 = vmatmul.mubr.bf16.gmra.mrb[16].mxu0 %v841_v29 }
 0x4ec   :  { %v654_v50 = vmul.f32 %v2495_v12, %v623_v32  ;;  %v655_v33 = vmul.f32 %v2498_v13, %v623_v32  ;;  %v844_v34 = vpack.c.bf16 %v832_v26, %v830_v30  ;;  %v843_v35 = vpack.c.bf16 %v831_v22, %v829_v23 }
 0x4ed   :  { %v813_v37 = vadd.f32 %v2506_v18, %v777_v49  ;;  %v814_v60 = vadd.f32 %v2510_v20, %v779_v28 }
 0x4ee   :  { %v781_v39 = vadd.f32 %v2447_v57, %v654_v50  ;;  %v783_v53 = vadd.f32 %v2449_v58, %v655_v33  ;;  %1719 = vmatprep.mubr.msk.bf16.mxu0 %vm1013_vm5, %v844_v34  ;;  %v1893_v57 = vld [vmem:[%s2808_s14 + $0x50] sm:$0xff]   ;;  %v1894_v58 = vld [vmem:[%s2808_s14 + $0x58] sm:$0xff]  }
 0x4ef   :  { %v833_v41 = vmax.f32 %v813_v37, 0.0  ;;  %v834_v12 = vmax.f32 %v814_v60, 0.0  ;;  %1300 = vmatpush1.bf16.msra.mxu1 %v1893_v57 }
 0x4f0   :  { %v815_v55 = vadd.f32 %v2506_v18, %v781_v39  ;;  %v816_v61 = vadd.f32 %v2510_v20, %v783_v53  ;;  %1301 = vmatprep.subr.bf16.mxu1 %v1960_v1  ;;  %v1895_v18 = vld [vmem:[%s2808_s14 + $0x60] sm:$0x1f]  }
 0x4f1   :  { %v1277_v20 = vand.u32 %v1895_v18, %v2405_v36 }
 0x4f2   :  { %v835_v63 = vmax.f32 %v815_v55, 0.0  ;;  %v836_v13 = vmax.f32 %v816_v61, 0.0 }
 0x4f3   :  { %1101 = vmatmul.mubr.bf16.gmra.mrb[20].mxu0 %v843_v35  ;;  %1302 = vmatpush1.bf16.msra.mxu1 %v1894_v58 }
 0x4f4   :  { %v846_v40 = vpack.c.bf16 %v836_v13, %v834_v12  ;;  %v845_v2 = vpack.c.bf16 %v835_v63, %v833_v41  ;;  %1303 = vmatprep.subr.bf16.mxu1 %v1960_v1 }
 0x4f6   :  { %1720 = vmatprep.mubr.msk.bf16.mxu0 %vm1013_vm5, %v846_v40 }
 0x4f7   :  { %1304 = vmatpush1.bf16.msra.mxu1 %v1277_v20 }
 0x4fb   :  { %1111 = vmatmul.mubr.bf16.gmra.mrb[24].mxu0 %v845_v2 }
 0x5ae   :  { %v1072_v6 = vpop.f32.mrb[8].mxu0 }
 0x5af   :  { %v1073_v7 = vadd.f32 %v1072_v6, %v2590_v4  ;;  %v1074_v8 = vpop.f32.mrb[9].mxu0 }
 0x5b0   :  { %v1075_v9 = vadd.f32 %v1074_v8, %v2593_v5  ;;  %v1076_v1 = vpop.f32.mrb[10].mxu0 }
 0x5b1   :  { %v1077_v36 = vadd.f32 %v1076_v1, %v2590_v4  ;;  %v1078_v43 = vpop.f32.mrb[11].mxu0  ;;  %v1121_v10 = vmax.f32 %v1073_v7, 0.0 }
 0x5b2   :  { %v1079_v44 = vadd.f32 %v1078_v43, %v2593_v5  ;;  %v1122_v0 = vmax.f32 %v1075_v9, 0.0 }
 0x5b3   :  { %v1123_v62 = vmax.f32 %v1077_v36, 0.0 }
 0x5b4   :  { %v1124_v52 = vmax.f32 %v1079_v44, 0.0 }
 0x5b5   :  { %v1141_v27 = vpack.c.bf16 %v1123_v62, %v1121_v10 }
 0x5b6   :  { %v1142_v29 = vpack.c.bf16 %v1124_v52, %v1122_v0  ;;  %v1082_v54 = vpop.f32.mrb[12].mxu0 }
 0x5b7   :  { %v1083_v11 = vadd.f32 %v1082_v54, %v2590_v4  ;;  %v1084_v14 = vpop.f32.mrb[13].mxu0 }
 0x5b8   :  { %v1085_v15 = vadd.f32 %v1084_v14, %v2593_v5  ;;  %v1086_v46 = vpop.f32.mrb[14].mxu0  ;;  %1735 = vmatprep.mubr.msk.bf16.mxu1 %vm1013_vm5, %v1142_v29 }
 0x5b9   :  { %v1087_v16 = vadd.f32 %v1086_v46, %v2590_v4  ;;  %v1088_v47 = vpop.f32.mrb[15].mxu0  ;;  %1312 = vmatmul.mubr.bf16.vlgmr.msra.gmra.mrb[24].mxu1 %v1141_v27  ;;  %v1125_v19 = vmax.f32 %v1083_v11, 0.0  ;;  %v1721_v46 = vld [vmem:[%s2812_s15] ss:$0 sm:$0xff] }
 0x5ba   :  { %v1089_v17 = vadd.f32 %v1088_v47, %v2593_v5  ;;  %v1126_v22 = vmax.f32 %v1085_v15, 0.0 }
 0x5bb   :  { %v1127_v21 = vmax.f32 %v1087_v16, 0.0 }
 0x5bc   :  { %v1128_v49 = vmax.f32 %v1089_v17, 0.0 }
 0x5bd   :  { %v1143_v28 = vpack.c.bf16 %v1127_v21, %v1125_v19 }
 0x5be   :  { %v1144_v23 = vpack.c.bf16 %v1128_v49, %v1126_v22  ;;  %v1092_v30 = vpop.f32.mrb[16].mxu0 }
 0x5bf   :  { %v1093_v26 = vadd.f32 %v1092_v30, %v2590_v4  ;;  %v1094_v32 = vpop.f32.mrb[17].mxu0 }
 0x5c0   :  { %v1095_v50 = vadd.f32 %v1094_v32, %v2593_v5  ;;  %v1096_v33 = vpop.f32.mrb[18].mxu0  ;;  %1736 = vmatprep.mubr.msk.bf16.mxu1 %vm1013_vm5, %v1144_v23 }
 0x5c1   :  { %v1097_v34 = vadd.f32 %v1096_v33, %v2590_v4  ;;  %v1098_v35 = vpop.f32.mrb[19].mxu0  ;;  %1320 = vmatmul.mubr.bf16.gmra.mrb[28].mxu1 %v1143_v28  ;;  %v1129_v60 = vmax.f32 %v1093_v26, 0.0 }
 0x5c2   :  { %v1099_v37 = vadd.f32 %v1098_v35, %v2593_v5  ;;  %v1130_v53 = vmax.f32 %v1095_v50, 0.0 }
 0x5c3   :  { %v1131_v39 = vmax.f32 %v1097_v34, 0.0 }
 0x5c4   :  { %v1132_v55 = vmax.f32 %v1099_v37, 0.0 }
 0x5c5   :  { %v1145_v61 = vpack.c.bf16 %v1131_v39, %v1129_v60 }
 0x5c6   :  { %v1146_v41 = vpack.c.bf16 %v1132_v55, %v1130_v53  ;;  %v1102_v12 = vpop.f32.mrb[20].mxu0 }
 0x5c7   :  { %v1103_v63 = vadd.f32 %v1102_v12, %v2590_v4  ;;  %v1104_v13 = vpop.f32.mrb[21].mxu0 }
 0x5c8   :  { %v1105_v40 = vadd.f32 %v1104_v13, %v2593_v5  ;;  %v1106_v2 = vpop.f32.mrb[22].mxu0  ;;  %1737 = vmatprep.mubr.msk.bf16.mxu1 %vm1013_vm5, %v1146_v41 }
 0x5c9   :  { %v1107_v57 = vadd.f32 %v1106_v2, %v2590_v4  ;;  %v1108_v58 = vpop.f32.mrb[23].mxu0  ;;  %1328 = vmatmul.mubr.bf16.gmra.mrb[32].mxu1 %v1145_v61  ;;  %v1133_v20 = vmax.f32 %v1103_v63, 0.0 }
 0x5ca   :  { %v1109_v18 = vadd.f32 %v1108_v58, %v2593_v5  ;;  %v1134_v6 = vmax.f32 %v1105_v40, 0.0 }
 0x5cb   :  { %v1135_v3 = vmax.f32 %v1107_v57, 0.0 }
 0x5cc   :  { %v1136_v7 = vmax.f32 %v1109_v18, 0.0 }
 0x5cd   :  { %v1147_v8 = vpack.c.bf16 %v1135_v3, %v1133_v20 }
 0x5ce   :  { %v1148_v9 = vpack.c.bf16 %v1136_v7, %v1134_v6  ;;  %v1112_v1 = vpop.f32.mrb[24].mxu0 }
 0x5cf   :  { %v1113_v36 = vadd.f32 %v1112_v1, %v2590_v4  ;;  %v1114_v43 = vpop.f32.mrb[25].mxu0 }
 0x5d0   :  { %v1115_v44 = vadd.f32 %v1114_v43, %v2593_v5  ;;  %v1116_v10 = vpop.f32.mrb[26].mxu0  ;;  %1738 = vmatprep.mubr.msk.bf16.mxu1 %vm1013_vm5, %v1148_v9 }
 0x5d1   :  { %v1117_v62 = vadd.f32 %v1116_v10, %v2590_v4  ;;  %v1118_v0 = vpop.f32.mrb[27].mxu0  ;;  %1336 = vmatmul.mubr.bf16.gmra.mrb[36].mxu1 %v1147_v8  ;;  %v1137_v27 = vmax.f32 %v1113_v36, 0.0 }
 0x5d2   :  { %v1119_v52 = vadd.f32 %v1118_v0, %v2593_v5  ;;  %v1138_v54 = vmax.f32 %v1115_v44, 0.0 }
 0x5d3   :  { %v1139_v29 = vmax.f32 %v1117_v62, 0.0 }
 0x5d4   :  { %v1140_v11 = vmax.f32 %v1119_v52, 0.0 }
 0x5d5   :  { %v1149_v14 = vpack.c.bf16 %v1139_v29, %v1137_v27 }
 0x5d6   :  { %v1150_v15 = vpack.c.bf16 %v1140_v11, %v1138_v54 }
 0x5d8   :  { %1739 = vmatprep.mubr.msk.bf16.mxu1 %vm1013_vm5, %v1150_v15 }
 0x5d9   :  { %1344 = vmatmul.mubr.bf16.gmra.mrb[40].mxu1 %v1149_v14 }
 0x68c   :  { %v1313_v16 = vpop.f32.mrb[24].mxu1 }
 0x68d   :  { %v1314_v4 = vadd.f32 %v1721_v46, %v1313_v16  ;;  %v1315_v47 = vpop.f32.mrb[25].mxu1 }
 0x68e   :  { %v1316_v17 = vpop.f32.mrb[26].mxu1 }
 0x68f   :  { %v1317_v19 = vadd.f32 %v1721_v46, %v1316_v17  ;;  %v1318_v5 = vpop.f32.mrb[27].mxu1  ;;  %v1353_v21 = vsel %vm1352_vm6, %v1314_v4, -inf }
 0x690   :  { %1354 = vmax.xlane.f32.xlu1 %v1353_v21 }
 0x691   :  { %v1356_v22 = vsel %vm1352_vm6, %v1317_v19, -inf }
 0x692   :  { %1357 = vmax.xlane.f32.xlu0 %v1356_v22 }
 0x694   :  { %v1321_v49 = vpop.f32.mrb[28].mxu1 }
 0x695   :  { %v1322_v28 = vadd.f32 %v1721_v46, %v1321_v49  ;;  %v1323_v23 = vpop.f32.mrb[29].mxu1 }
 0x696   :  { %v1324_v30 = vpop.f32.mrb[30].mxu1 }
 0x697   :  { %v1325_v26 = vadd.f32 %v1721_v46, %v1324_v30  ;;  %v1326_v32 = vpop.f32.mrb[31].mxu1  ;;  %v1359_v50 = vsel %vm1352_vm6, %v1322_v28, -inf }
 0x698   :  { %1360 = vmax.xlane.f32.xlu0 %v1359_v50 }
 0x699   :  { %v1362_v33 = vsel %vm1352_vm6, %v1325_v26, -inf }
 0x69a   :  { %1363 = vmax.xlane.f32.xlu1 %v1362_v33 }
 0x69c   :  { %v1329_v34 = vpop.f32.mrb[32].mxu1 }
 0x69d   :  { %v1330_v35 = vadd.f32 %v1721_v46, %v1329_v34  ;;  %v1331_v37 = vpop.f32.mrb[33].mxu1 }
 0x69e   :  { %v1332_v60 = vpop.f32.mrb[34].mxu1 }
 0x69f   :  { %v1333_v39 = vadd.f32 %v1721_v46, %v1332_v60  ;;  %v1334_v53 = vpop.f32.mrb[35].mxu1  ;;  %v1365_v55 = vsel %vm1352_vm6, %v1330_v35, -inf }
 0x6a0   :  { %1366 = vmax.xlane.f32.xlu0 %v1365_v55 }
 0x6a1   :  { %v1368_v61 = vsel %vm1352_vm6, %v1333_v39, -inf }
 0x6a2   :  { %1369 = vmax.xlane.f32.xlu1 %v1368_v61 }
 0x6a4   :  { %v1337_v41 = vpop.f32.mrb[36].mxu1 }
 0x6a5   :  { %v1338_v12 = vadd.f32 %v1721_v46, %v1337_v41  ;;  %v1339_v63 = vpop.f32.mrb[37].mxu1 }
 0x6a6   :  { %v1340_v13 = vpop.f32.mrb[38].mxu1 }
 0x6a7   :  { %v1341_v40 = vadd.f32 %v1721_v46, %v1340_v13  ;;  %v1342_v2 = vpop.f32.mrb[39].mxu1  ;;  %v1371_v57 = vsel %vm1352_vm6, %v1338_v12, -inf }
 0x6a8   :  { %1372 = vmax.xlane.f32.xlu0 %v1371_v57 }
 0x6a9   :  { %v1374_v58 = vsel %vm1352_vm6, %v1341_v40, -inf }
 0x6aa   :  { %1375 = vmax.xlane.f32.xlu1 %v1374_v58 }
 0x6ac   :  { %v1345_v18 = vpop.f32.mrb[40].mxu1 }
 0x6ad   :  { %v1346_v20 = vadd.f32 %v1721_v46, %v1345_v18  ;;  %v1347_v3 = vpop.f32.mrb[41].mxu1 }
 0x6ae   :  { %v1348_v6 = vpop.f32.mrb[42].mxu1 }
 0x6af   :  { %v1349_v7 = vadd.f32 %v1721_v46, %v1348_v6  ;;  %v1350_v8 = vpop.f32.mrb[43].mxu1  ;;  %v1377_v9 = vsel %vm1352_vm6, %v1346_v20, -inf }
 0x6b0   :  { %1378 = vmax.xlane.f32.xlu0 %v1377_v9  ;;  %v1741_v9 = vld [vmem:[%s2813_s2] sm:$0xff]  }
 0x6b1   :  { %v1380_v1 = vsel %vm1352_vm6, %v1349_v7, -inf }
 0x6b2   :  { %1381 = vmax.xlane.f32.xlu1 %v1380_v1 }
 0x71d   :  { %v1355_v36 = vpop.xlane.xlu1 %1354 }
 0x71e   :  { %v1383_v43 = vsub.f32 %v1314_v4, %v1355_v36 }
 0x71f   :  { %v1358_v44 = vpop.xlane.xlu0 %1357 }
 0x720   :  { %v1393_v10 = vmul.f32 1.442695, %v1383_v43  ;;  %v1384_v62 = vsub.f32 %v1317_v19, %v1358_v44  ;;  %v1742_v43 = vunpack.c.l.bf16 %v1741_v9 }
 0x722   :  { %1900 = vpow2.f32 %v1393_v10  ;;  %v1395_v0 = vmul.f32 1.442695, %v1384_v62  ;;  %v1743_v62 = vunpack.c.h.bf16 %v1741_v9 }
 0x724   :  { %1902 = vpow2.f32 %v1395_v0 }
 0x725   :  { %v1361_v52 = vpop.xlane.xlu0 %1360 }
 0x726   :  { %v1385_v27 = vsub.f32 %v1322_v28, %v1361_v52 }
 0x727   :  { %v1364_v29 = vpop.xlane.xlu1 %1363 }
 0x728   :  { %v1397_v54 = vmul.f32 1.442695, %v1385_v27  ;;  %v1386_v11 = vsub.f32 %v1325_v26, %v1364_v29  ;;  %v1760_v29 = vld [vmem:[%s2813_s2 + $0x8] sm:$0xff]  }
 0x72a   :  { %1904 = vpow2.f32 %v1397_v54  ;;  %v1399_v14 = vmul.f32 1.442695, %v1386_v11 }
 0x72c   :  { %v2633_v15 = vpop.eup %1900  ;;  %1906 = vpow2.f32 %v1399_v14 }
 0x72d   :  { %v1367_v46 = vpop.xlane.xlu0 %1366  ;;  %v1413_v16 = vsel %vm1352_vm6, %v2633_v15, 0.0 }
 0x72e   :  { %v2637_v4 = vpop.eup %1902  ;;  %v1387_v47 = vsub.f32 %v1330_v35, %v1367_v46  ;;  %1414 = vadd.xlane.f32.xlu0 %v1413_v16  ;;  %v1746_v16 = vunpack.c.l.bf16 %v1760_v29 }
 0x72f   :  { %v1370_v17 = vpop.xlane.xlu1 %1369  ;;  %v1416_v19 = vsel %vm1352_vm6, %v2637_v4, 0.0 }
 0x730   :  { %v1401_v5 = vmul.f32 1.442695, %v1387_v47  ;;  %v1388_v21 = vsub.f32 %v1333_v39, %v1370_v17  ;;  %1417 = vadd.xlane.f32.xlu1 %v1416_v19  ;;  %v1747_v17 = vunpack.c.h.bf16 %v1760_v29 }
 0x732   :  { %1908 = vpow2.f32 %v1401_v5  ;;  %v1403_v22 = vmul.f32 1.442695, %v1388_v21 }
 0x734   :  { %v2641_v49 = vpop.eup %1904  ;;  %1910 = vpow2.f32 %v1403_v22  ;;  %v1761_v22 = vld [vmem:[%s2813_s2 + $0x10] sm:$0xff]  }
 0x735   :  { %v1373_v28 = vpop.xlane.xlu0 %1372  ;;  %v1419_v23 = vsel %vm1352_vm6, %v2641_v49, 0.0 }
 0x736   :  { %v2645_v30 = vpop.eup %1906  ;;  %v1389_v26 = vsub.f32 %v1338_v12, %v1373_v28  ;;  %1420 = vadd.xlane.f32.xlu0 %v1419_v23 }
 0x737   :  { %v1376_v32 = vpop.xlane.xlu1 %1375  ;;  %v1422_v50 = vsel %vm1352_vm6, %v2645_v30, 0.0 }
 0x738   :  { %v1405_v33 = vmul.f32 1.442695, %v1389_v26  ;;  %v1390_v34 = vsub.f32 %v1341_v40, %v1376_v32  ;;  %1423 = vadd.xlane.f32.xlu1 %v1422_v50  ;;  %v1750_v50 = vunpack.c.l.bf16 %v1761_v22 }
 0x73a   :  { %1912 = vpow2.f32 %v1405_v33  ;;  %v1407_v35 = vmul.f32 1.442695, %v1390_v34  ;;  %v1751_v34 = vunpack.c.h.bf16 %v1761_v22 }
 0x73c   :  { %v2649_v37 = vpop.eup %1908  ;;  %1914 = vpow2.f32 %v1407_v35 }
 0x73d   :  { %v1379_v60 = vpop.xlane.xlu0 %1378  ;;  %v1425_v39 = vsel %vm1352_vm6, %v2649_v37, 0.0 }
 0x73e   :  { %v2653_v53 = vpop.eup %1910  ;;  %v1391_v55 = vsub.f32 %v1346_v20, %v1379_v60  ;;  %1426 = vadd.xlane.f32.xlu0 %v1425_v39 }
 0x73f   :  { %v1382_v61 = vpop.xlane.xlu1 %1381  ;;  %v1428_v41 = vsel %vm1352_vm6, %v2653_v53, 0.0 }
 0x740   :  { %v1409_v12 = vmul.f32 1.442695, %v1391_v55  ;;  %v1392_v63 = vsub.f32 %v1349_v7, %v1382_v61  ;;  %1429 = vadd.xlane.f32.xlu1 %v1428_v41  ;;  %v1762_v55 = vld [vmem:[%s2813_s2 + $0x18] sm:$0xff]  }
 0x742   :  { %1916 = vpow2.f32 %v1409_v12  ;;  %v1411_v13 = vmul.f32 1.442695, %v1392_v63 }
 0x744   :  { %v2657_v40 = vpop.eup %1912  ;;  %1918 = vpow2.f32 %v1411_v13  ;;  %v1754_v13 = vunpack.c.l.bf16 %v1762_v55 }
 0x745   :  { %v1431_v2 = vsel %vm1352_vm6, %v2657_v40, 0.0 }
 0x746   :  { %v2661_v57 = vpop.eup %1914  ;;  %1432 = vadd.xlane.f32.xlu0 %v1431_v2 }
 0x747   :  { %v1434_v58 = vsel %vm1352_vm6, %v2661_v57, 0.0 }
 0x748   :  { %1435 = vadd.xlane.f32.xlu1 %v1434_v58  ;;  %v1755_v58 = vunpack.c.h.bf16 %v1762_v55 }
 0x74c   :  { %v2665_v18 = vpop.eup %1916 }
 0x74d   :  { %v1437_v20 = vsel %vm1352_vm6, %v2665_v18, 0.0 }
 0x74e   :  { %v2669_v3 = vpop.eup %1918  ;;  %1438 = vadd.xlane.f32.xlu0 %v1437_v20 }
 0x74f   :  { %v1440_v6 = vsel %vm1352_vm6, %v2669_v3, 0.0 }
 0x750   :  { %1441 = vadd.xlane.f32.xlu1 %v1440_v6 }
 0x7bb   :  { %v1415_v7 = vpop.xlane.xlu0 %1414 }
 0x7bc   :  { %1920 = vrcp.f32 %v1415_v7 }
 0x7bd   :  { %v1418_v8 = vpop.xlane.xlu1 %1417 }
 0x7be   :  { %1922 = vrcp.f32 %v1418_v8  ;;  %v1763_v8 = vld [vmem:[%s2813_s2 + $0x20] sm:$0xff]  }
 0x7c3   :  { %v1421_v1 = vpop.xlane.xlu0 %1420 }
 0x7c4   :  { %1924 = vrcp.f32 %v1421_v1 }
 0x7c5   :  { %v1424_v36 = vpop.xlane.xlu1 %1423 }
 0x7c6   :  { %v1921_v44 = vpop.eup %1920  ;;  %1926 = vrcp.f32 %v1424_v36 }
 0x7c7   :  { %v1453_v10 = vmul.f32 %v1921_v44, %v2633_v15 }
 0x7c8   :  { %v1923_v0 = vpop.eup %1922 }
 0x7c9   :  { %v2677_v52 = vmul.f32 %v1742_v43, %v1453_v10  ;;  %v1454_v27 = vmul.f32 %v1923_v0, %v2637_v4  ;;  %v1759_v10 = vunpack.c.h.bf16 %v1763_v8 }
 0x7cb   :  { %v1427_v54 = vpop.xlane.xlu0 %1426  ;;  %v1493_v11 = vsel %vm1352_vm6, %v2677_v52, 0.0  ;;  %v2685_v14 = vmul.f32 %v1743_v62, %v1454_v27 }
 0x7cc   :  { %1928 = vrcp.f32 %v1427_v54  ;;  %1494 = vadd.xlane.f32.xlu0 %v1493_v11 }
 0x7cd   :  { %v1430_v46 = vpop.xlane.xlu1 %1429  ;;  %v1496_v15 = vsel %vm1352_vm6, %v2685_v14, 0.0 }
 0x7ce   :  { %v1925_v47 = vpop.eup %1924  ;;  %1930 = vrcp.f32 %v1430_v46  ;;  %1497 = vadd.xlane.f32.xlu1 %v1496_v15 }
 0x7cf   :  { %v1455_v4 = vmul.f32 %v1925_v47, %v2641_v49 }
 0x7d0   :  { %v1927_v19 = vpop.eup %1926 }
 0x7d1   :  { %v2690_v5 = vmul.f32 %v1746_v16, %v1455_v4  ;;  %v1456_v21 = vmul.f32 %v1927_v19, %v2645_v30 }
 0x7d3   :  { %v1433_v28 = vpop.xlane.xlu0 %1432  ;;  %v1499_v23 = vsel %vm1352_vm6, %v2690_v5, 0.0  ;;  %v2698_v26 = vmul.f32 %v1747_v17, %v1456_v21 }
 0x7d4   :  { %1932 = vrcp.f32 %v1433_v28  ;;  %1500 = vadd.xlane.f32.xlu0 %v1499_v23 }
 0x7d5   :  { %v1436_v32 = vpop.xlane.xlu1 %1435  ;;  %v1502_v49 = vsel %vm1352_vm6, %v2698_v26, 0.0 }
 0x7d6   :  { %v1929_v33 = vpop.eup %1928  ;;  %1934 = vrcp.f32 %v1436_v32  ;;  %1503 = vadd.xlane.f32.xlu1 %v1502_v49 }
 0x7d7   :  { %v1457_v30 = vmul.f32 %v1929_v33, %v2649_v37 }
 0x7d8   :  { %v1931_v35 = vpop.eup %1930 }
 0x7d9   :  { %v2703_v60 = vmul.f32 %v1750_v50, %v1457_v30  ;;  %v1458_v39 = vmul.f32 %v1931_v35, %v2653_v53 }
 0x7db   :  { %v1439_v61 = vpop.xlane.xlu0 %1438  ;;  %v1505_v41 = vsel %vm1352_vm6, %v2703_v60, 0.0  ;;  %v2711_v12 = vmul.f32 %v1751_v34, %v1458_v39 }
 0x7dc   :  { %1936 = vrcp.f32 %v1439_v61  ;;  %1506 = vadd.xlane.f32.xlu0 %v1505_v41 }
 0x7dd   :  { %v1442_v63 = vpop.xlane.xlu1 %1441  ;;  %v1508_v37 = vsel %vm1352_vm6, %v2711_v12, 0.0 }
 0x7de   :  { %v1933_v2 = vpop.eup %1932  ;;  %1938 = vrcp.f32 %v1442_v63  ;;  %1509 = vadd.xlane.f32.xlu1 %v1508_v37 }
 0x7df   :  { %v1459_v53 = vmul.f32 %v1933_v2, %v2657_v40  ;;  %v1758_v40 = vunpack.c.l.bf16 %v1763_v8 }
 0x7e0   :  { %v1935_v20 = vpop.eup %1934 }
 0x7e1   :  { %v2716_v6 = vmul.f32 %v1754_v13, %v1459_v53  ;;  %v1460_v7 = vmul.f32 %v1935_v20, %v2661_v57 }
 0x7e3   :  { %v1511_v9 = vsel %vm1352_vm6, %v2716_v6, 0.0  ;;  %v2724_v1 = vmul.f32 %v1755_v58, %v1460_v7 }
 0x7e4   :  { %1512 = vadd.xlane.f32.xlu0 %v1511_v9 }
 0x7e5   :  { %v1514_v36 = vsel %vm1352_vm6, %v2724_v1, 0.0 }
 0x7e6   :  { %v1937_v43 = vpop.eup %1936  ;;  %1515 = vadd.xlane.f32.xlu1 %v1514_v36 }
 0x7e7   :  { %v1461_v44 = vmul.f32 %v1937_v43, %v2665_v18 }
 0x7e8   :  { %v1939_v57 = vpop.eup %1938 }
 0x7e9   :  { %v2729_v62 = vmul.f32 %v1758_v40, %v1461_v44  ;;  %v1462_v0 = vmul.f32 %v1939_v57, %v2669_v3 }
 0x7eb   :  { %v1517_v27 = vsel %vm1352_vm6, %v2729_v62, 0.0  ;;  %v2734_v29 = vmul.f32 %v1759_v10, %v1462_v0 }
 0x7ec   :  { %1518 = vadd.xlane.f32.xlu0 %v1517_v27 }
 0x7ed   :  { %v1520_v54 = vsel %vm1352_vm6, %v2734_v29, 0.0 }
 0x7ee   :  { %1521 = vadd.xlane.f32.xlu1 %v1520_v54 }
 0x859   :  { %v1495_v11 = vpop.xlane.xlu0 %1494 }
 0x85a   :  { %v1523_v46 = vadd.f32 1e-06, %v1495_v11 }
 0x85b   :  { %v1498_v15 = vpop.xlane.xlu1 %1497 }
 0x85c   :  { %1940 = vrcp.f32 %v1523_v46  ;;  %v1524_v18 = vadd.f32 1e-06, %v1498_v15 }
 0x85e   :  { %1942 = vrcp.f32 %v1524_v18 }
 0x861   :  { %v1501_v16 = vpop.xlane.xlu0 %1500 }
 0x862   :  { %v1525_v47 = vadd.f32 1e-06, %v1501_v16 }
 0x863   :  { %v1504_v4 = vpop.xlane.xlu1 %1503 }
 0x864   :  { %1944 = vrcp.f32 %v1525_v47  ;;  %v1526_v3 = vadd.f32 1e-06, %v1504_v4 }
 0x866   :  { %v1941_v17 = vpop.eup %1940  ;;  %1946 = vrcp.f32 %v1526_v3 }
 0x867   :  { %v1534_v19 = vmul.f32 %v1941_v17, %v2289_v59 }
 0x868   :  { %v1943_v21 = vpop.eup %1942 }
 0x869   :  { %1555 = vperm.xlu0 %1775, %v1534_v19   ;;  %v1507_v22 = vpop.xlane.xlu0 %1506  ;;  %v1536_v28 = vmul.f32 %v1943_v21, %v2379_v25 }
 0x86a   :  { %v1527_v23 = vadd.f32 1e-06, %v1507_v22 }
 0x86b   :  { %1560 = vperm.xlu1 %1776, %v1536_v28   ;;  %v1510_v32 = vpop.xlane.xlu1 %1509 }
 0x86c   :  { %1948 = vrcp.f32 %v1527_v23  ;;  %v1528_v49 = vadd.f32 1e-06, %v1510_v32 }
 0x86e   :  { %v1945_v50 = vpop.eup %1944  ;;  %1950 = vrcp.f32 %v1528_v49 }
 0x86f   :  { %v1538_v33 = vmul.f32 %v1945_v50, %v2395_v31 }
 0x870   :  { %v1947_v30 = vpop.eup %1946 }
 0x871   :  { %v1513_v34 = vpop.xlane.xlu0 %1512  ;;  %1565 = vperm.xlu1 %1776, %v1538_v33   ;;  %v1540_v35 = vmul.f32 %v1947_v30, %v2377_v24 }
 0x872   :  { %v1529_v59 = vadd.f32 1e-06, %v1513_v34 }
 0x873   :  { %1570 = vperm.xlu0 %1775, %v1540_v35   ;;  %v1516_v39 = vpop.xlane.xlu1 %1515 }
 0x874   :  { %1952 = vrcp.f32 %v1529_v59  ;;  %v1530_v55 = vadd.f32 1e-06, %v1516_v39 }
 0x876   :  { %v1949_v25 = vpop.eup %1948  ;;  %1954 = vrcp.f32 %v1530_v55 }
 0x877   :  { %v1542_v61 = vmul.f32 %v1949_v25, %v2408_v38 }
 0x878   :  { %v1951_v41 = vpop.eup %1950 }
 0x879   :  { %v1519_v63 = vpop.xlane.xlu0 %1518  ;;  %1575 = vperm.xlu1 %1776, %v1542_v61   ;;  %v1544_v37 = vmul.f32 %v1951_v41, %v2416_v42 }
 0x87a   :  { %v1531_v31 = vadd.f32 1e-06, %v1519_v63 }
 0x87b   :  { %1580 = vperm.xlu0 %1775, %v1544_v37   ;;  %v1522_v13 = vpop.xlane.xlu1 %1521 }
 0x87c   :  { %1956 = vrcp.f32 %v1531_v31  ;;  %v1532_v2 = vadd.f32 1e-06, %v1522_v13 }
 0x87e   :  { %v1953_v24 = vpop.eup %1952  ;;  %1958 = vrcp.f32 %v1532_v2 }
 0x87f   :  { %v1546_v53 = vmul.f32 %v1953_v24, %v2423_v45 }
 0x880   :  { %v1955_v58 = vpop.eup %1954 }
 0x881   :  { %1585 = vperm.xlu1 %1776, %v1546_v53   ;;  %v1548_v20 = vmul.f32 %v1955_v58, %v2430_v48 }
 0x883   :  { %1590 = vperm.xlu0 %1775, %v1548_v20  }
 0x886   :  { %v1957_v38 = vpop.eup %1956 }
 0x887   :  { %v1550_v7 = vmul.f32 %v1957_v38, %v2437_v51 }
 0x888   :  { %v1959_v8 = vpop.eup %1958 }
 0x889   :  { %1595 = vperm.xlu1 %1776, %v1550_v7   ;;  %v1552_v42 = vmul.f32 %v1959_v8, %v2444_v56 }
 0x88b   :  { %1600 = vperm.xlu0 %1775, %v1552_v42  }
 0x8e8   :  { %v1556_v9 = vpop.permute.xlu0 %1555 }
 0x8e9   :  { %v1603_v36 = vmul.f32 %v1556_v9, %v2677_v52 }
 0x8ea   :  { %v1561_v40 = vpop.permute.xlu1 %1560 }
 0x8eb   :  { %1613 = vst.msk [vmem:[%s2814_s16] sm:$0xff] %vm1352_vm6, %v1603_v36  ;;  %v1604_v45 = vmul.f32 %v1561_v40, %v2685_v14 }
 0x8ed   :  { %1614 = vst.msk [vmem:[%s2814_s16 + $0x8] sm:$0xff] %vm1352_vm6, %v1604_v45 }
 0x8f0   :  { %v1566_v48 = vpop.permute.xlu1 %1565 }
 0x8f1   :  { %v1605_v51 = vmul.f32 %v1566_v48, %v2690_v5 }
 0x8f2   :  { %v1571_v56 = vpop.permute.xlu0 %1570 }
 0x8f3   :  { %1615 = vst.msk [vmem:[%s2814_s16 + $0x10] sm:$0xff] %vm1352_vm6, %v1605_v51  ;;  %v1606_v52 = vmul.f32 %v1571_v56, %v2698_v26 }
 0x8f5   :  { %1616 = vst.msk [vmem:[%s2814_s16 + $0x18] sm:$0xff] %vm1352_vm6, %v1606_v52 }
 0x8f8   :  { %v1576_v14 = vpop.permute.xlu1 %1575 }
 0x8f9   :  { %v1607_v43 = vmul.f32 %v1576_v14, %v2703_v60 }
 0x8fa   :  { %v1581_v44 = vpop.permute.xlu0 %1580 }
 0x8fb   :  { %1617 = vst.msk [vmem:[%s2814_s16 + $0x20] sm:$0xff] %vm1352_vm6, %v1607_v43  ;;  %v1608_v5 = vmul.f32 %v1581_v44, %v2711_v12 }
 0x8fd   :  { %1618 = vst.msk [vmem:[%s2814_s16 + $0x28] sm:$0xff] %vm1352_vm6, %v1608_v5 }
 0x900   :  { %v1586_v26 = vpop.permute.xlu1 %1585 }
 0x901   :  { %v1609_v10 = vmul.f32 %v1586_v26, %v2716_v6 }
 0x902   :  { %v1591_v57 = vpop.permute.xlu0 %1590 }
 0x903   :  { %1619 = vst.msk [vmem:[%s2814_s16 + $0x30] sm:$0xff] %vm1352_vm6, %v1609_v10  ;;  %v1610_v60 = vmul.f32 %v1591_v57, %v2724_v1 }
 0x905   :  { %1620 = vst.msk [vmem:[%s2814_s16 + $0x38] sm:$0xff] %vm1352_vm6, %v1610_v60 }
 0x908   :  { %v1596_v12 = vpop.permute.xlu1 %1595 }
 0x909   :  { %v1611_v0 = vmul.f32 %v1596_v12, %v2729_v62 }
 0x90a   :  { %v1601_v27 = vpop.permute.xlu0 %1600 }
 0x90b   :  { %1621 = vst.msk [vmem:[%s2814_s16 + $0x40] sm:$0xff] %vm1352_vm6, %v1611_v0  ;;  %v1612_v6 = vmul.f32 %v1601_v27, %v2734_v29 }
 0x90d   :  { %1622 = vst.msk [vmem:[%s2814_s16 + $0x48] sm:$0xff] %vm1352_vm6, %v1612_v6 }

</bundles_post_ra>
